<compile_context>
chip_gen: v5e
topology: v5e:2x2
jax: 0.10.0
libtpu: 0.0.40
codegen_flags: <defaults>
</compile_context>

<pallas_src>
import functools

import jax
import jax.numpy as jnp
from jax.experimental import pallas as pl
from jax.experimental.pallas import tpu as pltpu


_NT_DIMS = (((1,), (1,)), ((), ()))   # contract last dims of both operands: A @ B.T


def _layernorm(x, g, b, eps=1e-5):
    mean = jnp.mean(x, axis=-1, keepdims=True)
    var = jnp.mean(jnp.square(x - mean), axis=-1, keepdims=True)
    return (x - mean) * jax.lax.rsqrt(var + eps) * g + b


# ------------------------------ fully fused ViT kernel ------------------------------ #

def _vit_kernel(patches_ref, pe_w_ref, pe_b_ref, pos_ref, cls_ref,
                ln1_g_ref, ln1_b_ref, wqkv_ref, wo_ref, ob_ref,
                ln2_g_ref, ln2_b_ref, w1_ref, b1_ref, w2_ref, b2_ref,
                hg_ref, hb_ref, hw_ref, hbias_ref,
                o_ref, x_scr,
                *, heads, dim_head, pool, eps, approx_softmax):
    d = pl.program_id(1)
    inner = heads * dim_head

    # --- d == 0: fused patch embedding + cls token + positional embedding -----------
    @pl.when(d == 0)
    def _():
        p = patches_ref[0].astype(jnp.bfloat16)                            # [np, pd]
        emb = jnp.dot(p, pe_w_ref[...],
                      preferred_element_type=jnp.float32) + pe_b_ref[...]  # [np, dim]
        x_scr[0:1, :] = cls_ref[...] + pos_ref[0:1, :]                     # cls row
        x_scr[1:, :] = emb + pos_ref[1:, :]                                # patch rows

    x = x_scr[...]                                                          # [n, dim] f32

    # --- PreNorm + multi-head self-attention + residual -----------------------------
    h1 = _layernorm(x, ln1_g_ref[0], ln1_b_ref[0], eps).astype(jnp.bfloat16)
    # one wide QKV matmul (scale already folded into the Q columns of wqkv)
    qkv = jnp.dot(h1, wqkv_ref[0], preferred_element_type=jnp.float32)      # [n, 3*inner]

    heads_out = []
    for hh in range(heads):                       # small static unroll (heads == 4)
        lo = hh * dim_head
        q = qkv[:, lo:lo + dim_head].astype(jnp.bfloat16)
        k = qkv[:, inner + lo:inner + lo + dim_head].astype(jnp.bfloat16)
        v = qkv[:, 2 * inner + lo:2 * inner + lo + dim_head].astype(jnp.bfloat16)
        s = jax.lax.dot_general(q, k, _NT_DIMS,
                                preferred_element_type=jnp.float32)          # [n, n]
        s = s - jnp.max(s, axis=-1, keepdims=True)
        p_ = jnp.exp(s)
        denom = jnp.sum(p_, axis=-1, keepdims=True)
        if approx_softmax:
            inv = pl.reciprocal(denom, approx=True)   # EUP slot; exact path for verif.
        else:
            inv = 1.0 / denom
        oh = jnp.dot(p_.astype(jnp.bfloat16), v,
                     preferred_element_type=jnp.float32) * inv               # [n, dh]
        heads_out.append(oh)

    cat = jnp.concatenate(heads_out, axis=-1).astype(jnp.bfloat16)           # [n, inner]
    attn = jnp.dot(cat, wo_ref[0], preferred_element_type=jnp.float32) + ob_ref[0]
    x = x + attn

    # --- PreNorm + FeedForward (Linear -> ReLU -> Linear) + residual ----------------
    h2 = _layernorm(x, ln2_g_ref[0], ln2_b_ref[0], eps).astype(jnp.bfloat16)
    f = jnp.dot(h2, w1_ref[0], preferred_element_type=jnp.float32) + b1_ref[0]
    f = jnp.maximum(f, 0.0).astype(jnp.bfloat16)
    f = jnp.dot(f, w2_ref[0], preferred_element_type=jnp.float32) + b2_ref[0]
    x = x + f
    x_scr[...] = x                                   # residual stream stays in VMEM

    # --- d == depth-1: pooling + mlp_head (LayerNorm -> ReLU -> Linear) -------------
    @pl.when(d == pl.num_programs(1) - 1)
    def _():
        if pool == "mean":
            pooled = jnp.mean(x, axis=0, keepdims=True)                      # [1, dim]
        else:
            pooled = x[0:1, :]                                               # cls token
        y = _layernorm(pooled, hg_ref[...], hb_ref[...], eps)
        y = jnp.maximum(y, 0.0)                      # spec's mlp_head has a ReLU
        o_ref[0] = (jnp.dot(y.astype(jnp.bfloat16), hw_ref[...],
                            preferred_element_type=jnp.float32)
                    + hbias_ref[...]).astype(o_ref.dtype)


# ----------------------------------- ViT forward ----------------------------------- #

def vit_forward(img, params, cfg):
    b = img.shape[0]
    p1, p2, p3 = cfg["patch_size"]
    ih, iw, idp = cfg["image_size"]
    h, w_, c = ih // p1, iw // p2, idp // p3
    dim, heads, dim_head = cfg["dim"], cfg["heads"], cfg["dim_head"]
    depth, nc = cfg["depth"], cfg["num_classes"]
    num_patches = h * w_ * c
    patch_dim = p1 * p2 * p3
    n = num_patches + 1

    # Rearrange 'b (c p3) (h p1) (w p2) -> b (h w c) (p1 p2 p3)'
    # TODO(synk): this einops patch rearrange is pure layout; done once with XLA
    # reshape/transpose glue (at production image sizes fold it into the embed DMA).
    x = img.reshape(b, c, p3, h, p1, w_, p2)
    x = x.transpose(0, 3, 5, 1, 4, 6, 2)                 # b h w c p1 p2 p3
    patches = x.reshape(b, num_patches, patch_dim)

    kern = functools.partial(_vit_kernel, heads=heads, dim_head=dim_head,
                             pool=cfg["pool"], eps=1e-5, approx_softmax=True)

    args = (patches, params["pe_w"], params["pe_b"], params["pos"], params["cls"],
            params["ln1_g"], params["ln1_b"], params["w_qkv"], params["wo"],
            params["out_b"], params["ln2_g"], params["ln2_b"], params["ff1_w"],
            params["ff1_b"], params["ff2_w"], params["ff2_b"],
            params["head_g"], params["head_b"], params["head_w"], params["head_bias"])

    def const_spec(a):              # full array, same block every grid step
        zeros = (0,) * a.ndim
        return pl.BlockSpec(a.shape, lambda i, d, _z=zeros: _z)

    def layer_spec(a):              # depth-stacked weight, indexed by grid axis d
        tail = (0,) * (a.ndim - 1)
        return pl.BlockSpec((1,) + a.shape[1:], lambda i, d, _t=tail: (d,) + _t)

    in_specs = [pl.BlockSpec((1, num_patches, patch_dim), lambda i, d: (i, 0, 0))]
    in_specs += [const_spec(a) for a in args[1:5]]        # pe_w, pe_b, pos, cls
    in_specs += [layer_spec(a) for a in args[5:16]]       # per-layer stacked weights
    in_specs += [const_spec(a) for a in args[16:20]]      # head params

    out = pl.pallas_call(
        kern,
        out_shape=jax.ShapeDtypeStruct((b, 1, nc), jnp.float32),
        grid=(b, depth),
        in_specs=in_specs,
        out_specs=pl.BlockSpec((1, 1, nc), lambda i, d: (i, 0, 0)),
        scratch_shapes=[pltpu.VMEM((n, dim), jnp.float32)],   # residual stream
        compiler_params=pltpu.CompilerParams(
            dimension_semantics=("parallel", "arbitrary"),
            vmem_limit_bytes=32 * 1024 * 1024),
    )(*args)
    return out[:, 0, :]                                        # [b, num_classes]


# ---------------------------------- parameter init ---------------------------------- #

def init_params(key, cfg):
    dim, heads, dh = cfg["dim"], cfg["heads"], cfg["dim_head"]
    mlp, nc, depth = cfg["mlp_dim"], cfg["num_classes"], cfg["depth"]
    p1, p2, p3 = cfg["patch_size"]
    ih, iw, idp = cfg["image_size"]
    num_patches = (ih // p1) * (iw // p2) * (idp // p3)
    patch_dim = p1 * p2 * p3
    inner = heads * dh
    scale = dh ** -0.5

    keys = iter(jax.random.split(key, 32 + 8 * depth))

    def w(shape, std=0.02, dtype=jnp.bfloat16):
        # Matmul weights live in bf16 (MXU-native, half the weight DMA); accum is f32.
        return (std * jax.random.normal(next(keys), shape)).astype(dtype)

    # Fused QKV weight [depth, dim, 3*inner] == torch to_qkv.weight.T, with the
    # attention scale pre-folded into the Q columns (q @ k.T * scale == (x@Wq*scale) @ k.T).
    wq = 0.02 * jax.random.normal(next(keys), (depth, dim, inner)) * scale
    wk = 0.02 * jax.random.normal(next(keys), (depth, dim, inner))
    wv = 0.02 * jax.random.normal(next(keys), (depth, dim, inner))
    w_qkv = jnp.concatenate([wq, wk, wv], axis=-1).astype(jnp.bfloat16)

    return {
        "pe_w": w((patch_dim, dim)),
        "pe_b": jnp.zeros((1, dim), jnp.float32),
        "pos": jax.random.normal(next(keys), (num_patches + 1, dim), dtype=jnp.float32),
        "cls": jax.random.normal(next(keys), (1, dim), dtype=jnp.float32),
        "ln1_g": jnp.ones((depth, 1, dim), jnp.float32),
        "ln1_b": jnp.zeros((depth, 1, dim), jnp.float32),
        "w_qkv": w_qkv,
        "wo": w((depth, inner, dim)),                 # concat-heads out-projection
        "out_b": jnp.zeros((depth, 1, dim), jnp.float32),
        "ln2_g": jnp.ones((depth, 1, dim), jnp.float32),
        "ln2_b": jnp.zeros((depth, 1, dim), jnp.float32),
        "ff1_w": w((depth, dim, mlp)),
        "ff1_b": jnp.zeros((depth, 1, mlp), jnp.float32),
        "ff2_w": w((depth, mlp, dim)),
        "ff2_b": jnp.zeros((depth, 1, dim), jnp.float32),
        "head_g": jnp.ones((1, dim), jnp.float32),
        "head_b": jnp.zeros((1, dim), jnp.float32),
        "head_w": w((dim, nc)),
        "head_bias": jnp.zeros((1, nc), jnp.float32),
    }


# ---------------------------------------- main --------------------------------------- #

if __name__ == "__main__":
    cfg = dict(
        image_size=(8, 8, 8),    # (H, W, D)
        patch_size=(4, 4, 4),
        num_classes=10,
        dim=32,
        depth=2,
        heads=4,
        dim_head=8,
        mlp_dim=64,
        pool="cls",
    )
    key = jax.random.PRNGKey(0)
    pkey, xkey = jax.random.split(key)
    params = init_params(pkey, cfg)

    # img: [b, image_depth, image_height, image_width] = [2, 8, 8, 8]
    img = jax.random.normal(xkey, (2, 8, 8, 8), dtype=jnp.float32)

    fwd = jax.jit(functools.partial(vit_forward, cfg=cfg))
    logits = fwd(img, params)
    jax.block_until_ready(logits)
    assert logits.shape == (2, cfg["num_classes"]), logits.shape
    print("KERNEL_OK")
</pallas_src>

<mosaic_0001>
module attributes {stable_mosaic.version = 11 : i64} {
  func.func @_vit_kernel(%arg0: i32, %arg1: i32, %arg2: memref<1x8x64xf32, #tpu.memory_space<vmem>>, %arg3: memref<64x32xbf16, #tpu.memory_space<vmem>>, %arg4: memref<1x32xf32, #tpu.memory_space<vmem>>, %arg5: memref<9x32xf32, #tpu.memory_space<vmem>>, %arg6: memref<1x32xf32, #tpu.memory_space<vmem>>, %arg7: memref<1x1x32xf32, #tpu.memory_space<vmem>>, %arg8: memref<1x1x32xf32, #tpu.memory_space<vmem>>, %arg9: memref<1x32x96xbf16, #tpu.memory_space<vmem>>, %arg10: memref<1x32x32xbf16, #tpu.memory_space<vmem>>, %arg11: memref<1x1x32xf32, #tpu.memory_space<vmem>>, %arg12: memref<1x1x32xf32, #tpu.memory_space<vmem>>, %arg13: memref<1x1x32xf32, #tpu.memory_space<vmem>>, %arg14: memref<1x32x64xbf16, #tpu.memory_space<vmem>>, %arg15: memref<1x1x64xf32, #tpu.memory_space<vmem>>, %arg16: memref<1x64x32xbf16, #tpu.memory_space<vmem>>, %arg17: memref<1x1x32xf32, #tpu.memory_space<vmem>>, %arg18: memref<1x32xf32, #tpu.memory_space<vmem>>, %arg19: memref<1x32xf32, #tpu.memory_space<vmem>>, %arg20: memref<32x10xbf16, #tpu.memory_space<vmem>>, %arg21: memref<1x10xf32, #tpu.memory_space<vmem>>, %arg22: memref<1x1x10xf32, #tpu.memory_space<vmem>>, %arg23: memref<9x32xf32, #tpu.memory_space<vmem>>) attributes {dimension_semantics = [#tpu.dimension_semantics<parallel>, #tpu.dimension_semantics<arbitrary>], iteration_bounds = array<i64: 2, 2>, scalar_prefetch = 0 : i64, scratch_operands = 1 : i64, tpu.core_type = #tpu.core_type<tc>, window_params = [{transform_indices = @transform_0, window_bounds = array<i64: 1, 8, 64>}, {pipeline_mode = #tpu.pipeline_mode<synchronous>, transform_indices = @transform_1, window_bounds = array<i64: 64, 32>}, {pipeline_mode = #tpu.pipeline_mode<synchronous>, transform_indices = @transform_2, window_bounds = array<i64: 1, 32>}, {pipeline_mode = #tpu.pipeline_mode<synchronous>, transform_indices = @transform_3, window_bounds = array<i64: 9, 32>}, {pipeline_mode = #tpu.pipeline_mode<synchronous>, transform_indices = @transform_4, window_bounds = array<i64: 1, 32>}, {transform_indices = @transform_5, window_bounds = array<i64: 1, 1, 32>}, {transform_indices = @transform_6, window_bounds = array<i64: 1, 1, 32>}, {transform_indices = @transform_7, window_bounds = array<i64: 1, 32, 96>}, {transform_indices = @transform_8, window_bounds = array<i64: 1, 32, 32>}, {transform_indices = @transform_9, window_bounds = array<i64: 1, 1, 32>}, {transform_indices = @transform_10, window_bounds = array<i64: 1, 1, 32>}, {transform_indices = @transform_11, window_bounds = array<i64: 1, 1, 32>}, {transform_indices = @transform_12, window_bounds = array<i64: 1, 32, 64>}, {transform_indices = @transform_13, window_bounds = array<i64: 1, 1, 64>}, {transform_indices = @transform_14, window_bounds = array<i64: 1, 64, 32>}, {transform_indices = @transform_15, window_bounds = array<i64: 1, 1, 32>}, {pipeline_mode = #tpu.pipeline_mode<synchronous>, transform_indices = @transform_16, window_bounds = array<i64: 1, 32>}, {pipeline_mode = #tpu.pipeline_mode<synchronous>, transform_indices = @transform_17, window_bounds = array<i64: 1, 32>}, {pipeline_mode = #tpu.pipeline_mode<synchronous>, transform_indices = @transform_18, window_bounds = array<i64: 32, 10>}, {pipeline_mode = #tpu.pipeline_mode<synchronous>, transform_indices = @transform_19, window_bounds = array<i64: 1, 10>}, {transform_indices = @transform_20, window_bounds = array<i64: 1, 1, 10>}]} {
    %c0_i32 = arith.constant 0 : i32
    %0 = arith.cmpi eq, %arg1, %c0_i32 : i32
    %1 = arith.extui %0 : i1 to i32
    %c0_i32_0 = arith.constant 0 : i32
    %2 = arith.cmpi ne, %1, %c0_i32_0 : i32
    scf.if %2 {
      %c0_68 = arith.constant 0 : index
      %c0_69 = arith.constant 0 : index
      %c0_70 = arith.constant 0 : index
      %169 = vector.load %arg2[%c0_68, %c0_69, %c0_70] : memref<1x8x64xf32, #tpu.memory_space<vmem>>, vector<1x8x64xf32>
      %170 = vector.shape_cast %169 : vector<1x8x64xf32> to vector<8x64xf32>
      %171 = arith.truncf %170 : vector<8x64xf32> to vector<8x64xbf16>
      %c0_71 = arith.constant 0 : index
      %c0_72 = arith.constant 0 : index
      %172 = vector.load %arg3[%c0_71, %c0_72] : memref<64x32xbf16, #tpu.memory_space<vmem>>, vector<64x32xbf16>
      %cst_73 = arith.constant dense<0.000000e+00> : vector<8x32xf32>
      %173 = tpu.matmul %171, %172, %cst_73 {dimension_numbers = #tpu.dot_dimension_numbers<[1], [0], [0], [1], [0, 0, 1, 1], [], []>} : vector<8x64xbf16>, vector<64x32xbf16>, vector<8x32xf32> -> vector<8x32xf32>
      %c0_74 = arith.constant 0 : index
      %c0_75 = arith.constant 0 : index
      %174 = vector.load %arg4[%c0_74, %c0_75] : memref<1x32xf32, #tpu.memory_space<vmem>>, vector<1x32xf32>
      %175 = vector.broadcast %174 : vector<1x32xf32> to vector<8x32xf32>
      %176 = arith.addf %173, %175 : vector<8x32xf32>
      %c0_76 = arith.constant 0 : index
      %c0_77 = arith.constant 0 : index
      %177 = vector.load %arg6[%c0_76, %c0_77] : memref<1x32xf32, #tpu.memory_space<vmem>>, vector<1x32xf32>
      %c0_78 = arith.constant 0 : index
      %c0_79 = arith.constant 0 : index
      %178 = vector.load %arg5[%c0_78, %c0_79] : memref<9x32xf32, #tpu.memory_space<vmem>>, vector<1x32xf32>
      %179 = arith.addf %177, %178 : vector<1x32xf32>
      %c0_80 = arith.constant 0 : index
      %c0_81 = arith.constant 0 : index
      %180 = vector.load %arg23[%c0_80, %c0_81] : memref<9x32xf32, #tpu.memory_space<vmem>>, vector<1x32xf32>
      tpu.vector_store %arg23[%c0_80, %c0_81], %179 {strides = array<i32>} : memref<9x32xf32, #tpu.memory_space<vmem>>, vector<1x32xf32>,
      %c1 = arith.constant 1 : index
      %c0_82 = arith.constant 0 : index
      %181 = vector.load %arg5[%c1, %c0_82] : memref<9x32xf32, #tpu.memory_space<vmem>>, vector<8x32xf32>
      %182 = arith.addf %176, %181 : vector<8x32xf32>
      %c1_83 = arith.constant 1 : index
      %c0_84 = arith.constant 0 : index
      %183 = vector.load %arg23[%c1_83, %c0_84] : memref<9x32xf32, #tpu.memory_space<vmem>>, vector<8x32xf32>
      tpu.vector_store %arg23[%c1_83, %c0_84], %182 {strides = array<i32>} : memref<9x32xf32, #tpu.memory_space<vmem>>, vector<8x32xf32>,
    } else {
    }
    %c0 = arith.constant 0 : index
    %c0_1 = arith.constant 0 : index
    %3 = vector.load %arg23[%c0, %c0_1] : memref<9x32xf32, #tpu.memory_space<vmem>>, vector<9x32xf32>
    %c0_2 = arith.constant 0 : index
    %c0_3 = arith.constant 0 : index
    %c0_4 = arith.constant 0 : index
    %4 = vector.load %arg7[%c0_2, %c0_3, %c0_4] : memref<1x1x32xf32, #tpu.memory_space<vmem>>, vector<1x1x32xf32>
    %5 = vector.shape_cast %4 : vector<1x1x32xf32> to vector<1x32xf32>
    %c0_5 = arith.constant 0 : index
    %c0_6 = arith.constant 0 : index
    %c0_7 = arith.constant 0 : index
    %6 = vector.load %arg8[%c0_5, %c0_6, %c0_7] : memref<1x1x32xf32, #tpu.memory_space<vmem>>, vector<1x1x32xf32>
    %7 = vector.shape_cast %6 : vector<1x1x32xf32> to vector<1x32xf32>
    %cst = arith.constant dense<0.000000e+00> : vector<9xf32>
    %8 = vector.multi_reduction <add>, %3, %cst [1] : vector<9x32xf32> to vector<9xf32>
    %9 = vector.shape_cast %8 : vector<9xf32> to vector<9x1xf32>
    %cst_8 = arith.constant 3.200000e+01 : f32
    %10 = vector.broadcast %cst_8 : f32 to vector<9x1xf32>
    %11 = arith.divf %9, %10 : vector<9x1xf32>
    %12 = vector.broadcast %11 : vector<9x1xf32> to vector<9x32xf32>
    %13 = arith.subf %3, %12 : vector<9x32xf32>
    %14 = arith.mulf %13, %13 : vector<9x32xf32>
    %cst_9 = arith.constant dense<0.000000e+00> : vector<9xf32>
    %15 = vector.multi_reduction <add>, %14, %cst_9 [1] : vector<9x32xf32> to vector<9xf32>
    %16 = vector.shape_cast %15 : vector<9xf32> to vector<9x1xf32>
    %cst_10 = arith.constant 3.200000e+01 : f32
    %17 = vector.broadcast %cst_10 : f32 to vector<9x1xf32>
    %18 = arith.divf %16, %17 : vector<9x1xf32>
    %19 = vector.broadcast %11 : vector<9x1xf32> to vector<9x32xf32>
    %20 = arith.subf %3, %19 : vector<9x32xf32>
    %cst_11 = arith.constant 9.99999974E-6 : f32
    %21 = vector.broadcast %cst_11 : f32 to vector<9x1xf32>
    %22 = arith.addf %18, %21 : vector<9x1xf32>
    %23 = math.rsqrt %22 : vector<9x1xf32>
    %24 = vector.broadcast %23 : vector<9x1xf32> to vector<9x32xf32>
    %25 = arith.mulf %20, %24 : vector<9x32xf32>
    %26 = vector.broadcast %5 : vector<1x32xf32> to vector<9x32xf32>
    %27 = arith.mulf %25, %26 : vector<9x32xf32>
    %28 = vector.broadcast %7 : vector<1x32xf32> to vector<9x32xf32>
    %29 = arith.addf %27, %28 : vector<9x32xf32>
    %30 = arith.truncf %29 : vector<9x32xf32> to vector<9x32xbf16>
    %c0_12 = arith.constant 0 : index
    %c0_13 = arith.constant 0 : index
    %c0_14 = arith.constant 0 : index
    %31 = vector.load %arg9[%c0_12, %c0_13, %c0_14] : memref<1x32x96xbf16, #tpu.memory_space<vmem>>, vector<1x32x96xbf16>
    %32 = vector.shape_cast %31 : vector<1x32x96xbf16> to vector<32x96xbf16>
    %cst_15 = arith.constant dense<0.000000e+00> : vector<9x96xf32>
    %33 = tpu.matmul %30, %32, %cst_15 {dimension_numbers = #tpu.dot_dimension_numbers<[1], [0], [0], [1], [0, 0, 1, 1], [], []>} : vector<9x32xbf16>, vector<32x96xbf16>, vector<9x96xf32> -> vector<9x96xf32>
    %34 = vector.extract_strided_slice %33 {offsets = [0, 0], sizes = [9, 8], strides = [1, 1]} : vector<9x96xf32> to vector<9x8xf32>
    %35 = arith.truncf %34 : vector<9x8xf32> to vector<9x8xbf16>
    %36 = vector.extract_strided_slice %33 {offsets = [0, 32], sizes = [9, 8], strides = [1, 1]} : vector<9x96xf32> to vector<9x8xf32>
    %37 = arith.truncf %36 : vector<9x8xf32> to vector<9x8xbf16>
    %38 = vector.extract_strided_slice %33 {offsets = [0, 64], sizes = [9, 8], strides = [1, 1]} : vector<9x96xf32> to vector<9x8xf32>
    %39 = arith.truncf %38 : vector<9x8xf32> to vector<9x8xbf16>
    %cst_16 = arith.constant dense<0.000000e+00> : vector<9x9xf32>
    %40 = tpu.matmul %35, %37, %cst_16 {dimension_numbers = #tpu.dot_dimension_numbers<[1], [1], [0], [0], [0, 0, 1, 0], [], []>} : vector<9x8xbf16>, vector<9x8xbf16>, vector<9x9xf32> -> vector<9x9xf32>
    %cst_17 = arith.constant dense<0xFF800000> : vector<9xf32>
    %41 = vector.multi_reduction <maximumf>, %40, %cst_17 [1] : vector<9x9xf32> to vector<9xf32>
    %42 = vector.shape_cast %41 : vector<9xf32> to vector<9x1xf32>
    %43 = vector.broadcast %42 : vector<9x1xf32> to vector<9x9xf32>
    %44 = arith.subf %40, %43 : vector<9x9xf32>
    %45 = math.exp %44 : vector<9x9xf32>
    %cst_18 = arith.constant dense<0.000000e+00> : vector<9xf32>
    %46 = vector.multi_reduction <add>, %45, %cst_18 [1] : vector<9x9xf32> to vector<9xf32>
    %47 = vector.shape_cast %46 : vector<9xf32> to vector<9x1xf32>
    %48 = tpu.reciprocal %47 {approx = true} : vector<9x1xf32> -> vector<9x1xf32>
    %49 = arith.truncf %45 : vector<9x9xf32> to vector<9x9xbf16>
    %cst_19 = arith.constant dense<0.000000e+00> : vector<9x8xf32>
    %50 = tpu.matmul %49, %39, %cst_19 {dimension_numbers = #tpu.dot_dimension_numbers<[1], [0], [0], [1], [0, 0, 1, 1], [], []>} : vector<9x9xbf16>, vector<9x8xbf16>, vector<9x8xf32> -> vector<9x8xf32>
    %51 = vector.broadcast %48 : vector<9x1xf32> to vector<9x8xf32>
    %52 = arith.mulf %50, %51 : vector<9x8xf32>
    %53 = vector.extract_strided_slice %33 {offsets = [0, 8], sizes = [9, 8], strides = [1, 1]} : vector<9x96xf32> to vector<9x8xf32>
    %54 = arith.truncf %53 : vector<9x8xf32> to vector<9x8xbf16>
    %55 = vector.extract_strided_slice %33 {offsets = [0, 40], sizes = [9, 8], strides = [1, 1]} : vector<9x96xf32> to vector<9x8xf32>
    %56 = arith.truncf %55 : vector<9x8xf32> to vector<9x8xbf16>
    %57 = vector.extract_strided_slice %33 {offsets = [0, 72], sizes = [9, 8], strides = [1, 1]} : vector<9x96xf32> to vector<9x8xf32>
    %58 = arith.truncf %57 : vector<9x8xf32> to vector<9x8xbf16>
    %cst_20 = arith.constant dense<0.000000e+00> : vector<9x9xf32>
    %59 = tpu.matmul %54, %56, %cst_20 {dimension_numbers = #tpu.dot_dimension_numbers<[1], [1], [0], [0], [0, 0, 1, 0], [], []>} : vector<9x8xbf16>, vector<9x8xbf16>, vector<9x9xf32> -> vector<9x9xf32>
    %cst_21 = arith.constant dense<0xFF800000> : vector<9xf32>
    %60 = vector.multi_reduction <maximumf>, %59, %cst_21 [1] : vector<9x9xf32> to vector<9xf32>
    %61 = vector.shape_cast %60 : vector<9xf32> to vector<9x1xf32>
    %62 = vector.broadcast %61 : vector<9x1xf32> to vector<9x9xf32>
    %63 = arith.subf %59, %62 : vector<9x9xf32>
    %64 = math.exp %63 : vector<9x9xf32>
    %cst_22 = arith.constant dense<0.000000e+00> : vector<9xf32>
    %65 = vector.multi_reduction <add>, %64, %cst_22 [1] : vector<9x9xf32> to vector<9xf32>
    %66 = vector.shape_cast %65 : vector<9xf32> to vector<9x1xf32>
    %67 = tpu.reciprocal %66 {approx = true} : vector<9x1xf32> -> vector<9x1xf32>
    %68 = arith.truncf %64 : vector<9x9xf32> to vector<9x9xbf16>
    %cst_23 = arith.constant dense<0.000000e+00> : vector<9x8xf32>
    %69 = tpu.matmul %68, %58, %cst_23 {dimension_numbers = #tpu.dot_dimension_numbers<[1], [0], [0], [1], [0, 0, 1, 1], [], []>} : vector<9x9xbf16>, vector<9x8xbf16>, vector<9x8xf32> -> vector<9x8xf32>
    %70 = vector.broadcast %67 : vector<9x1xf32> to vector<9x8xf32>
    %71 = arith.mulf %69, %70 : vector<9x8xf32>
    %72 = vector.extract_strided_slice %33 {offsets = [0, 16], sizes = [9, 8], strides = [1, 1]} : vector<9x96xf32> to vector<9x8xf32>
    %73 = arith.truncf %72 : vector<9x8xf32> to vector<9x8xbf16>
    %74 = vector.extract_strided_slice %33 {offsets = [0, 48], sizes = [9, 8], strides = [1, 1]} : vector<9x96xf32> to vector<9x8xf32>
    %75 = arith.truncf %74 : vector<9x8xf32> to vector<9x8xbf16>
    %76 = vector.extract_strided_slice %33 {offsets = [0, 80], sizes = [9, 8], strides = [1, 1]} : vector<9x96xf32> to vector<9x8xf32>
    %77 = arith.truncf %76 : vector<9x8xf32> to vector<9x8xbf16>
    %cst_24 = arith.constant dense<0.000000e+00> : vector<9x9xf32>
    %78 = tpu.matmul %73, %75, %cst_24 {dimension_numbers = #tpu.dot_dimension_numbers<[1], [1], [0], [0], [0, 0, 1, 0], [], []>} : vector<9x8xbf16>, vector<9x8xbf16>, vector<9x9xf32> -> vector<9x9xf32>
    %cst_25 = arith.constant dense<0xFF800000> : vector<9xf32>
    %79 = vector.multi_reduction <maximumf>, %78, %cst_25 [1] : vector<9x9xf32> to vector<9xf32>
    %80 = vector.shape_cast %79 : vector<9xf32> to vector<9x1xf32>
    %81 = vector.broadcast %80 : vector<9x1xf32> to vector<9x9xf32>
    %82 = arith.subf %78, %81 : vector<9x9xf32>
    %83 = math.exp %82 : vector<9x9xf32>
    %cst_26 = arith.constant dense<0.000000e+00> : vector<9xf32>
    %84 = vector.multi_reduction <add>, %83, %cst_26 [1] : vector<9x9xf32> to vector<9xf32>
    %85 = vector.shape_cast %84 : vector<9xf32> to vector<9x1xf32>
    %86 = tpu.reciprocal %85 {approx = true} : vector<9x1xf32> -> vector<9x1xf32>
    %87 = arith.truncf %83 : vector<9x9xf32> to vector<9x9xbf16>
    %cst_27 = arith.constant dense<0.000000e+00> : vector<9x8xf32>
    %88 = tpu.matmul %87, %77, %cst_27 {dimension_numbers = #tpu.dot_dimension_numbers<[1], [0], [0], [1], [0, 0, 1, 1], [], []>} : vector<9x9xbf16>, vector<9x8xbf16>, vector<9x8xf32> -> vector<9x8xf32>
    %89 = vector.broadcast %86 : vector<9x1xf32> to vector<9x8xf32>
    %90 = arith.mulf %88, %89 : vector<9x8xf32>
    %91 = vector.extract_strided_slice %33 {offsets = [0, 24], sizes = [9, 8], strides = [1, 1]} : vector<9x96xf32> to vector<9x8xf32>
    %92 = arith.truncf %91 : vector<9x8xf32> to vector<9x8xbf16>
    %93 = vector.extract_strided_slice %33 {offsets = [0, 56], sizes = [9, 8], strides = [1, 1]} : vector<9x96xf32> to vector<9x8xf32>
    %94 = arith.truncf %93 : vector<9x8xf32> to vector<9x8xbf16>
    %95 = vector.extract_strided_slice %33 {offsets = [0, 88], sizes = [9, 8], strides = [1, 1]} : vector<9x96xf32> to vector<9x8xf32>
    %96 = arith.truncf %95 : vector<9x8xf32> to vector<9x8xbf16>
    %cst_28 = arith.constant dense<0.000000e+00> : vector<9x9xf32>
    %97 = tpu.matmul %92, %94, %cst_28 {dimension_numbers = #tpu.dot_dimension_numbers<[1], [1], [0], [0], [0, 0, 1, 0], [], []>} : vector<9x8xbf16>, vector<9x8xbf16>, vector<9x9xf32> -> vector<9x9xf32>
    %cst_29 = arith.constant dense<0xFF800000> : vector<9xf32>
    %98 = vector.multi_reduction <maximumf>, %97, %cst_29 [1] : vector<9x9xf32> to vector<9xf32>
    %99 = vector.shape_cast %98 : vector<9xf32> to vector<9x1xf32>
    %100 = vector.broadcast %99 : vector<9x1xf32> to vector<9x9xf32>
    %101 = arith.subf %97, %100 : vector<9x9xf32>
    %102 = math.exp %101 : vector<9x9xf32>
    %cst_30 = arith.constant dense<0.000000e+00> : vector<9xf32>
    %103 = vector.multi_reduction <add>, %102, %cst_30 [1] : vector<9x9xf32> to vector<9xf32>
    %104 = vector.shape_cast %103 : vector<9xf32> to vector<9x1xf32>
    %105 = tpu.reciprocal %104 {approx = true} : vector<9x1xf32> -> vector<9x1xf32>
    %106 = arith.truncf %102 : vector<9x9xf32> to vector<9x9xbf16>
    %cst_31 = arith.constant dense<0.000000e+00> : vector<9x8xf32>
    %107 = tpu.matmul %106, %96, %cst_31 {dimension_numbers = #tpu.dot_dimension_numbers<[1], [0], [0], [1], [0, 0, 1, 1], [], []>} : vector<9x9xbf16>, vector<9x8xbf16>, vector<9x8xf32> -> vector<9x8xf32>
    %108 = vector.broadcast %105 : vector<9x1xf32> to vector<9x8xf32>
    %109 = arith.mulf %107, %108 : vector<9x8xf32>
    %110 = tpu.concatenate %52, %71, %90, %109 in 1 : vector<9x8xf32>, vector<9x8xf32>, vector<9x8xf32>, vector<9x8xf32> -> vector<9x32xf32>
    %111 = arith.truncf %110 : vector<9x32xf32> to vector<9x32xbf16>
    %c0_32 = arith.constant 0 : index
    %c0_33 = arith.constant 0 : index
    %c0_34 = arith.constant 0 : index
    %112 = vector.load %arg10[%c0_32, %c0_33, %c0_34] : memref<1x32x32xbf16, #tpu.memory_space<vmem>>, vector<1x32x32xbf16>
    %113 = vector.shape_cast %112 : vector<1x32x32xbf16> to vector<32x32xbf16>
    %cst_35 = arith.constant dense<0.000000e+00> : vector<9x32xf32>
    %114 = tpu.matmul %111, %113, %cst_35 {dimension_numbers = #tpu.dot_dimension_numbers<[1], [0], [0], [1], [0, 0, 1, 1], [], []>} : vector<9x32xbf16>, vector<32x32xbf16>, vector<9x32xf32> -> vector<9x32xf32>
    %c0_36 = arith.constant 0 : index
    %c0_37 = arith.constant 0 : index
    %c0_38 = arith.constant 0 : index
    %115 = vector.load %arg11[%c0_36, %c0_37, %c0_38] : memref<1x1x32xf32, #tpu.memory_space<vmem>>, vector<1x1x32xf32>
    %116 = vector.shape_cast %115 : vector<1x1x32xf32> to vector<1x32xf32>
    %117 = vector.broadcast %116 : vector<1x32xf32> to vector<9x32xf32>
    %118 = arith.addf %114, %117 : vector<9x32xf32>
    %119 = arith.addf %3, %118 : vector<9x32xf32>
    %c0_39 = arith.constant 0 : index
    %c0_40 = arith.constant 0 : index
    %c0_41 = arith.constant 0 : index
    %120 = vector.load %arg12[%c0_39, %c0_40, %c0_41] : memref<1x1x32xf32, #tpu.memory_space<vmem>>, vector<1x1x32xf32>
    %121 = vector.shape_cast %120 : vector<1x1x32xf32> to vector<1x32xf32>
    %c0_42 = arith.constant 0 : index
    %c0_43 = arith.constant 0 : index
    %c0_44 = arith.constant 0 : index
    %122 = vector.load %arg13[%c0_42, %c0_43, %c0_44] : memref<1x1x32xf32, #tpu.memory_space<vmem>>, vector<1x1x32xf32>
    %123 = vector.shape_cast %122 : vector<1x1x32xf32> to vector<1x32xf32>
    %cst_45 = arith.constant dense<0.000000e+00> : vector<9xf32>
    %124 = vector.multi_reduction <add>, %119, %cst_45 [1] : vector<9x32xf32> to vector<9xf32>
    %125 = vector.shape_cast %124 : vector<9xf32> to vector<9x1xf32>
    %cst_46 = arith.constant 3.200000e+01 : f32
    %126 = vector.broadcast %cst_46 : f32 to vector<9x1xf32>
    %127 = arith.divf %125, %126 : vector<9x1xf32>
    %128 = vector.broadcast %127 : vector<9x1xf32> to vector<9x32xf32>
    %129 = arith.subf %119, %128 : vector<9x32xf32>
    %130 = arith.mulf %129, %129 : vector<9x32xf32>
    %cst_47 = arith.constant dense<0.000000e+00> : vector<9xf32>
    %131 = vector.multi_reduction <add>, %130, %cst_47 [1] : vector<9x32xf32> to vector<9xf32>
    %132 = vector.shape_cast %131 : vector<9xf32> to vector<9x1xf32>
    %cst_48 = arith.constant 3.200000e+01 : f32
    %133 = vector.broadcast %cst_48 : f32 to vector<9x1xf32>
    %134 = arith.divf %132, %133 : vector<9x1xf32>
    %135 = vector.broadcast %127 : vector<9x1xf32> to vector<9x32xf32>
    %136 = arith.subf %119, %135 : vector<9x32xf32>
    %cst_49 = arith.constant 9.99999974E-6 : f32
    %137 = vector.broadcast %cst_49 : f32 to vector<9x1xf32>
    %138 = arith.addf %134, %137 : vector<9x1xf32>
    %139 = math.rsqrt %138 : vector<9x1xf32>
    %140 = vector.broadcast %139 : vector<9x1xf32> to vector<9x32xf32>
    %141 = arith.mulf %136, %140 : vector<9x32xf32>
    %142 = vector.broadcast %121 : vector<1x32xf32> to vector<9x32xf32>
    %143 = arith.mulf %141, %142 : vector<9x32xf32>
    %144 = vector.broadcast %123 : vector<1x32xf32> to vector<9x32xf32>
    %145 = arith.addf %143, %144 : vector<9x32xf32>
    %146 = arith.truncf %145 : vector<9x32xf32> to vector<9x32xbf16>
    %c0_50 = arith.constant 0 : index
    %c0_51 = arith.constant 0 : index
    %c0_52 = arith.constant 0 : index
    %147 = vector.load %arg14[%c0_50, %c0_51, %c0_52] : memref<1x32x64xbf16, #tpu.memory_space<vmem>>, vector<1x32x64xbf16>
    %148 = vector.shape_cast %147 : vector<1x32x64xbf16> to vector<32x64xbf16>
    %cst_53 = arith.constant dense<0.000000e+00> : vector<9x64xf32>
    %149 = tpu.matmul %146, %148, %cst_53 {dimension_numbers = #tpu.dot_dimension_numbers<[1], [0], [0], [1], [0, 0, 1, 1], [], []>} : vector<9x32xbf16>, vector<32x64xbf16>, vector<9x64xf32> -> vector<9x64xf32>
    %c0_54 = arith.constant 0 : index
    %c0_55 = arith.constant 0 : index
    %c0_56 = arith.constant 0 : index
    %150 = vector.load %arg15[%c0_54, %c0_55, %c0_56] : memref<1x1x64xf32, #tpu.memory_space<vmem>>, vector<1x1x64xf32>
    %151 = vector.shape_cast %150 : vector<1x1x64xf32> to vector<1x64xf32>
    %152 = vector.broadcast %151 : vector<1x64xf32> to vector<9x64xf32>
    %153 = arith.addf %149, %152 : vector<9x64xf32>
    %cst_57 = arith.constant 0.000000e+00 : f32
    %154 = vector.broadcast %cst_57 : f32 to vector<9x64xf32>
    %155 = arith.maximumf %153, %154 : vector<9x64xf32>
    %156 = arith.truncf %155 : vector<9x64xf32> to vector<9x64xbf16>
    %c0_58 = arith.constant 0 : index
    %c0_59 = arith.constant 0 : index
    %c0_60 = arith.constant 0 : index
    %157 = vector.load %arg16[%c0_58, %c0_59, %c0_60] : memref<1x64x32xbf16, #tpu.memory_space<vmem>>, vector<1x64x32xbf16>
    %158 = vector.shape_cast %157 : vector<1x64x32xbf16> to vector<64x32xbf16>
    %cst_61 = arith.constant dense<0.000000e+00> : vector<9x32xf32>
    %159 = tpu.matmul %156, %158, %cst_61 {dimension_numbers = #tpu.dot_dimension_numbers<[1], [0], [0], [1], [0, 0, 1, 1], [], []>} : vector<9x64xbf16>, vector<64x32xbf16>, vector<9x32xf32> -> vector<9x32xf32>
    %c0_62 = arith.constant 0 : index
    %c0_63 = arith.constant 0 : index
    %c0_64 = arith.constant 0 : index
    %160 = vector.load %arg17[%c0_62, %c0_63, %c0_64] : memref<1x1x32xf32, #tpu.memory_space<vmem>>, vector<1x1x32xf32>
    %161 = vector.shape_cast %160 : vector<1x1x32xf32> to vector<1x32xf32>
    %162 = vector.broadcast %161 : vector<1x32xf32> to vector<9x32xf32>
    %163 = arith.addf %159, %162 : vector<9x32xf32>
    %164 = arith.addf %119, %163 : vector<9x32xf32>
    %c0_65 = arith.constant 0 : index
    %c0_66 = arith.constant 0 : index
    %165 = vector.load %arg23[%c0_65, %c0_66] : memref<9x32xf32, #tpu.memory_space<vmem>>, vector<9x32xf32>
    tpu.vector_store %arg23[%c0_65, %c0_66], %164 {strides = array<i32>} : memref<9x32xf32, #tpu.memory_space<vmem>>, vector<9x32xf32>,
    %c1_i32 = arith.constant 1 : i32
    %166 = arith.cmpi eq, %arg1, %c1_i32 : i32
    %167 = arith.extui %166 : i1 to i32
    %c0_i32_67 = arith.constant 0 : i32
    %168 = arith.cmpi ne, %167, %c0_i32_67 : i32
    scf.if %168 {
      %169 = vector.extract_strided_slice %164 {offsets = [0, 0], sizes = [1, 32], strides = [1, 1]} : vector<9x32xf32> to vector<1x32xf32>
      %c0_68 = arith.constant 0 : index
      %c0_69 = arith.constant 0 : index
      %170 = vector.load %arg18[%c0_68, %c0_69] : memref<1x32xf32, #tpu.memory_space<vmem>>, vector<1x32xf32>
      %c0_70 = arith.constant 0 : index
      %c0_71 = arith.constant 0 : index
      %171 = vector.load %arg19[%c0_70, %c0_71] : memref<1x32xf32, #tpu.memory_space<vmem>>, vector<1x32xf32>
      %cst_72 = arith.constant dense<0.000000e+00> : vector<1xf32>
      %172 = vector.multi_reduction <add>, %169, %cst_72 [1] : vector<1x32xf32> to vector<1xf32>
      %173 = vector.shape_cast %172 : vector<1xf32> to vector<1x1xf32>
      %cst_73 = arith.constant 3.200000e+01 : f32
      %174 = vector.broadcast %cst_73 : f32 to vector<1x1xf32>
      %175 = arith.divf %173, %174 : vector<1x1xf32>
      %176 = vector.broadcast %175 : vector<1x1xf32> to vector<1x32xf32>
      %177 = arith.subf %169, %176 : vector<1x32xf32>
      %178 = arith.mulf %177, %177 : vector<1x32xf32>
      %cst_74 = arith.constant dense<0.000000e+00> : vector<1xf32>
      %179 = vector.multi_reduction <add>, %178, %cst_74 [1] : vector<1x32xf32> to vector<1xf32>
      %180 = vector.shape_cast %179 : vector<1xf32> to vector<1x1xf32>
      %cst_75 = arith.constant 3.200000e+01 : f32
      %181 = vector.broadcast %cst_75 : f32 to vector<1x1xf32>
      %182 = arith.divf %180, %181 : vector<1x1xf32>
      %183 = vector.broadcast %175 : vector<1x1xf32> to vector<1x32xf32>
      %184 = arith.subf %169, %183 : vector<1x32xf32>
      %cst_76 = arith.constant 9.99999974E-6 : f32
      %185 = vector.broadcast %cst_76 : f32 to vector<1x1xf32>
      %186 = arith.addf %182, %185 : vector<1x1xf32>
      %187 = math.rsqrt %186 : vector<1x1xf32>
      %188 = vector.broadcast %187 : vector<1x1xf32> to vector<1x32xf32>
      %189 = arith.mulf %184, %188 : vector<1x32xf32>
      %190 = arith.mulf %189, %170 : vector<1x32xf32>
      %191 = arith.addf %190, %171 : vector<1x32xf32>
      %cst_77 = arith.constant 0.000000e+00 : f32
      %192 = vector.broadcast %cst_77 : f32 to vector<1x32xf32>
      %193 = arith.maximumf %191, %192 : vector<1x32xf32>
      %194 = arith.truncf %193 : vector<1x32xf32> to vector<1x32xbf16>
      %c0_78 = arith.constant 0 : index
      %c0_79 = arith.constant 0 : index
      %195 = vector.load %arg20[%c0_78, %c0_79] : memref<32x10xbf16, #tpu.memory_space<vmem>>, vector<32x10xbf16>
      %cst_80 = arith.constant dense<0.000000e+00> : vector<1x10xf32>
      %196 = tpu.matmul %194, %195, %cst_80 {dimension_numbers = #tpu.dot_dimension_numbers<[1], [0], [0], [1], [0, 0, 1, 1], [], []>} : vector<1x32xbf16>, vector<32x10xbf16>, vector<1x10xf32> -> vector<1x10xf32>
      %c0_81 = arith.constant 0 : index
      %c0_82 = arith.constant 0 : index
      %197 = vector.load %arg21[%c0_81, %c0_82] : memref<1x10xf32, #tpu.memory_space<vmem>>, vector<1x10xf32>
      %198 = arith.addf %196, %197 : vector<1x10xf32>
      %c0_83 = arith.constant 0 : index
      %c0_84 = arith.constant 0 : index
      %c0_85 = arith.constant 0 : index
      %199 = vector.load %arg22[%c0_83, %c0_84, %c0_85] : memref<1x1x10xf32, #tpu.memory_space<vmem>>, vector<1x1x10xf32>
      %200 = vector.shape_cast %199 : vector<1x1x10xf32> to vector<1x10xf32>
      %201 = vector.shape_cast %198 : vector<1x10xf32> to vector<1x1x10xf32>
      tpu.vector_store %arg22[%c0_83, %c0_84, %c0_85], %201 {strides = array<i32>} : memref<1x1x10xf32, #tpu.memory_space<vmem>>, vector<1x1x10xf32>,
    } else {
    }
    return
  }
  func.func @transform_0(%arg0: i32, %arg1: i32) -> (i32, i32, i32) {
    %c0_i32 = arith.constant 0 : i32
    %c0_i32_0 = arith.constant 0 : i32
    %c0_i32_1 = arith.constant 0 : i32
    return %arg0, %c0_i32, %c0_i32_0 : i32, i32, i32
  }
  func.func @transform_1(%arg0: i32, %arg1: i32) -> (i32, i32) {
    %c0_i32 = arith.constant 0 : i32
    %c0_i32_0 = arith.constant 0 : i32
    %c0_i32_1 = arith.constant 0 : i32
    return %c0_i32, %c0_i32_0 : i32, i32
  }
  func.func @transform_2(%arg0: i32, %arg1: i32) -> (i32, i32) {
    %c0_i32 = arith.constant 0 : i32
    %c0_i32_0 = arith.constant 0 : i32
    %c0_i32_1 = arith.constant 0 : i32
    return %c0_i32, %c0_i32_0 : i32, i32
  }
  func.func @transform_3(%arg0: i32, %arg1: i32) -> (i32, i32) {
    %c0_i32 = arith.constant 0 : i32
    %c0_i32_0 = arith.constant 0 : i32
    %c0_i32_1 = arith.constant 0 : i32
    return %c0_i32, %c0_i32_0 : i32, i32
  }
  func.func @transform_4(%arg0: i32, %arg1: i32) -> (i32, i32) {
    %c0_i32 = arith.constant 0 : i32
    %c0_i32_0 = arith.constant 0 : i32
    %c0_i32_1 = arith.constant 0 : i32
    return %c0_i32, %c0_i32_0 : i32, i32
  }
  func.func @transform_5(%arg0: i32, %arg1: i32) -> (i32, i32, i32) {
    %c0_i32 = arith.constant 0 : i32
    %c0_i32_0 = arith.constant 0 : i32
    %c0_i32_1 = arith.constant 0 : i32
    return %arg1, %c0_i32, %c0_i32_0 : i32, i32, i32
  }
  func.func @transform_6(%arg0: i32, %arg1: i32) -> (i32, i32, i32) {
    %c0_i32 = arith.constant 0 : i32
    %c0_i32_0 = arith.constant 0 : i32
    %c0_i32_1 = arith.constant 0 : i32
    return %arg1, %c0_i32, %c0_i32_0 : i32, i32, i32
  }
  func.func @transform_7(%arg0: i32, %arg1: i32) -> (i32, i32, i32) {
    %c0_i32 = arith.constant 0 : i32
    %c0_i32_0 = arith.constant 0 : i32
    %c0_i32_1 = arith.constant 0 : i32
    return %arg1, %c0_i32, %c0_i32_0 : i32, i32, i32
  }
  func.func @transform_8(%arg0: i32, %arg1: i32) -> (i32, i32, i32) {
    %c0_i32 = arith.constant 0 : i32
    %c0_i32_0 = arith.constant 0 : i32
    %c0_i32_1 = arith.constant 0 : i32
    return %arg1, %c0_i32, %c0_i32_0 : i32, i32, i32
  }
  func.func @transform_9(%arg0: i32, %arg1: i32) -> (i32, i32, i32) {
    %c0_i32 = arith.constant 0 : i32
    %c0_i32_0 = arith.constant 0 : i32
    %c0_i32_1 = arith.constant 0 : i32
    return %arg1, %c0_i32, %c0_i32_0 : i32, i32, i32
  }
  func.func @transform_10(%arg0: i32, %arg1: i32) -> (i32, i32, i32) {
    %c0_i32 = arith.constant 0 : i32
    %c0_i32_0 = arith.constant 0 : i32
    %c0_i32_1 = arith.constant 0 : i32
    return %arg1, %c0_i32, %c0_i32_0 : i32, i32, i32
  }
  func.func @transform_11(%arg0: i32, %arg1: i32) -> (i32, i32, i32) {
    %c0_i32 = arith.constant 0 : i32
    %c0_i32_0 = arith.constant 0 : i32
    %c0_i32_1 = arith.constant 0 : i32
    return %arg1, %c0_i32, %c0_i32_0 : i32, i32, i32
  }
  func.func @transform_12(%arg0: i32, %arg1: i32) -> (i32, i32, i32) {
    %c0_i32 = arith.constant 0 : i32
    %c0_i32_0 = arith.constant 0 : i32
    %c0_i32_1 = arith.constant 0 : i32
    return %arg1, %c0_i32, %c0_i32_0 : i32, i32, i32
  }
  func.func @transform_13(%arg0: i32, %arg1: i32) -> (i32, i32, i32) {
    %c0_i32 = arith.constant 0 : i32
    %c0_i32_0 = arith.constant 0 : i32
    %c0_i32_1 = arith.constant 0 : i32
    return %arg1, %c0_i32, %c0_i32_0 : i32, i32, i32
  }
  func.func @transform_14(%arg0: i32, %arg1: i32) -> (i32, i32, i32) {
    %c0_i32 = arith.constant 0 : i32
    %c0_i32_0 = arith.constant 0 : i32
    %c0_i32_1 = arith.constant 0 : i32
    return %arg1, %c0_i32, %c0_i32_0 : i32, i32, i32
  }
  func.func @transform_15(%arg0: i32, %arg1: i32) -> (i32, i32, i32) {
    %c0_i32 = arith.constant 0 : i32
    %c0_i32_0 = arith.constant 0 : i32
    %c0_i32_1 = arith.constant 0 : i32
    return %arg1, %c0_i32, %c0_i32_0 : i32, i32, i32
  }
  func.func @transform_16(%arg0: i32, %arg1: i32) -> (i32, i32) {
    %c0_i32 = arith.constant 0 : i32
    %c0_i32_0 = arith.constant 0 : i32
    %c0_i32_1 = arith.constant 0 : i32
    return %c0_i32, %c0_i32_0 : i32, i32
  }
  func.func @transform_17(%arg0: i32, %arg1: i32) -> (i32, i32) {
    %c0_i32 = arith.constant 0 : i32
    %c0_i32_0 = arith.constant 0 : i32
    %c0_i32_1 = arith.constant 0 : i32
    return %c0_i32, %c0_i32_0 : i32, i32
  }
  func.func @transform_18(%arg0: i32, %arg1: i32) -> (i32, i32) {
    %c0_i32 = arith.constant 0 : i32
    %c0_i32_0 = arith.constant 0 : i32
    %c0_i32_1 = arith.constant 0 : i32
    return %c0_i32, %c0_i32_0 : i32, i32
  }
  func.func @transform_19(%arg0: i32, %arg1: i32) -> (i32, i32) {
    %c0_i32 = arith.constant 0 : i32
    %c0_i32_0 = arith.constant 0 : i32
    %c0_i32_1 = arith.constant 0 : i32
    return %c0_i32, %c0_i32_0 : i32, i32
  }
  func.func @transform_20(%arg0: i32, %arg1: i32) -> (i32, i32, i32) {
    %c0_i32 = arith.constant 0 : i32
    %c0_i32_0 = arith.constant 0 : i32
    %c0_i32_1 = arith.constant 0 : i32
    return %arg0, %c0_i32, %c0_i32_0 : i32, i32, i32
  }
}

</mosaic_0001>

<bundles_post_ra>
// kernel: vit_forward.1
= control target key start
LH: loop header
LB: loop body
LE: loop exit
PB: predicated region body
PF: predicated region fallthrough
CT: control target
= control target key end

     0   :  { %s2601_s0 = inlined_call_operand.vmem [shape: f32[2,8,64], index: 0, kind: input, shape index: {}]   ;;  %s2602_s1 = inlined_call_operand.vmem [shape: bf16[64,32], index: 1, kind: input, shape index: {}]   ;;  %s2603_s2 = inlined_call_operand.vmem [shape: f32[1,32], index: 2, kind: input, shape index: {}]   ;;  %s2604_s3 = inlined_call_operand.vmem [shape: f32[9,32], index: 3, kind: input, shape index: {}]   ;;  %s2605_s4 = inlined_call_operand.vmem [shape: f32[1,32], index: 4, kind: input, shape index: {}]   ;;  %s2606_s5 = inlined_call_operand.vmem [shape: f32[2,1,32], index: 5, kind: input, shape index: {}]   ;;  %s2607_s6 = inlined_call_operand.vmem [shape: f32[2,1,32], index: 6, kind: input, shape index: {}]   ;;  %s2608_s7 = inlined_call_operand.vmem [shape: bf16[2,32,96], index: 7, kind: input, shape index: {}]   ;;  %s2609_s8 = inlined_call_operand.vmem [shape: bf16[2,32,32], index: 8, kind: input, shape index: {}]   ;;  %s2610_s9 = inlined_call_operand.vmem [shape: f32[2,1,32], index: 9, kind: input, shape index: {}]   ;;  %s2611_s10 = inlined_call_operand.vmem [shape: f32[2,1,32], index: 10, kind: input, shape index: {}]   ;;  %s2612_s11 = inlined_call_operand.vmem [shape: f32[2,1,32], index: 11, kind: input, shape index: {}]   ;;  %s2613_s12 = inlined_call_operand.vmem [shape: bf16[2,32,64], index: 12, kind: input, shape index: {}]   ;;  %s2614_s13 = inlined_call_operand.vmem [shape: f32[2,1,64], index: 13, kind: input, shape index: {}]   ;;  %s2615_s14 = inlined_call_operand.vmem [shape: bf16[2,64,32], index: 14, kind: input, shape index: {}]   ;;  %s2616_s15 = inlined_call_operand.vmem [shape: f32[2,1,32], index: 15, kind: input, shape index: {}]   ;;  %s2617_s16 = inlined_call_operand.vmem [shape: f32[1,32], index: 16, kind: input, shape index: {}]   ;;  %s2618_s17 = inlined_call_operand.vmem [shape: f32[1,32], index: 17, kind: input, shape index: {}]   ;;  %s2619_s18 = inlined_call_operand.vmem [shape: bf16[32,10], index: 18, kind: input, shape index: {}]   ;;  %s2620_s19 = inlined_call_operand.vmem [shape: f32[1,10], index: 19, kind: input, shape index: {}]   ;;  %s2621_s20 = inlined_call_operand.hbm [shape: f32[2,1,10], index: 20, kind: output, shape index: {}]  }
   0x1   :  { %2638 = sst [smem:[#allocation18_spill]] %s2601_s0 }
   0x2   :  { %2639 = sst [smem:[#allocation19_spill]] %s2602_s1 }
   0x3   :  { %2640 = sst [smem:[#allocation20_spill]] %s2603_s2 }
   0x4   :  { %2641 = sst [smem:[#allocation21_spill]] %s2604_s3 }
   0x5   :  { %2642 = sst [smem:[#allocation22_spill]] %s2605_s4 }
   0x6   :  { %2643 = sst [smem:[#allocation23_spill]] %s2608_s7 }
   0x7   :  { %2644 = sst [smem:[#allocation24_spill]] %s2609_s8 }
   0x8   :  { %2645 = sst [smem:[#allocation25_spill]] %s2617_s16 }
   0x9   :  { %2646 = sst [smem:[#allocation26_spill]] %s2618_s17 }
   0xa   :  { %2647 = sst [smem:[#allocation27_spill]] %s2619_s18 }
   0xb   :  { %2648 = sst [smem:[#allocation28_spill]] %s2620_s19 }
   0xc   :  { %2649 = sst [smem:[#allocation29_spill]] %s2621_s20 }
   0xd   :  { %25 = vsyncpa [#allocation4], 0 }
   0xe   :  { %27 = vsyncpa [#allocation4 + $0x1], 0  ;;  %s2238_s1 = smov 0   ;;  %s2240_s22 = smov 0  }
   0xf   :  { %s2242_s23 = smov 0   ;;  %s2244_s24 = smov 0  }
  0x10   :  { %s2246_s2 = smov 0   ;;  %s2248_s25 = smov 0  }
  0x11   :  { %s2250_s3 = smov 0   ;;  %s2252_s26 = smov 0  }
  0x12 LB: > { %2650 = sst [smem:[#allocation6_spill]] %s2087_s1  ;;  %s1751_s27 = sadd.s32 4294967295, %s2115_s26   ;;  %s2115_s26 = sphi %s2252_s26, %s33_s26   ;;  %s2111_s3 = sphi %s2250_s3, %s2697_s3   ;;  %s2107_s25 = sphi %s2248_s25, %s2696_s25   ;;  %s2103_s2 = sphi %s2246_s2, %s2695_s2   ;;  %s2099_s24 = sphi %s2244_s24, %s2694_s24   ;;  %s2095_s23 = sphi %s2242_s23, %s2693_s23   ;;  %s2091_s22 = sphi %s2240_s22, %s2699_s22   ;;  %s2087_s1 = sphi %s2238_s1, %s2698_s1  }
  0x13   : > { %2651 = sst [smem:[#allocation7_spill]] %s2095_s23  ;;  %s1752_s28 = sadd.s32 4294967294, %s2115_s26  }
  0x14   : > { %2652 = sst [smem:[#allocation8_spill]] %s2099_s24  ;;  %s42_s4 = sadd.s32 1, %s2107_s25 }
  0x15   : > { %2653 = sst [smem:[#allocation9_spill]] %s2103_s2  ;;  %p43_p0 = scmp.ge.s32.totalorder %s42_s4, 2 }
  0x16   : > { %2654 = sst [smem:[#allocation10_spill]] %s2107_s25  ;;  %s45_s29 = sadd.s32 1, %s2111_s3 }
  0x17   : > { %2655 = sst [smem:[#allocation11_spill]] %s2111_s3  ;;  %p542_p1 = scmp.ne.s32.totalorder %s2095_s23, %s2091_s22 }
  0x18   : > { %2656 = sst [smem:[#allocation12_spill]] %s2115_s26  ;;  %p543_p2 = scmp.eq.s32.totalorder %s1751_s27, 3 }
  0x19   : > { %s2701_s4 = smov (%p43_p0, %s42_s4), 0  ;;  %s2703_s29 = smov (!%p43_p0, %s45_s29), %s2111_s3 }
  0x1a   : > { %2657 = sst [smem:[#allocation13_spill]] %s2701_s4  ;;  %p2287_p3 = por %p543_p2, %p542_p1 }
  0x1b   : > { %p548_p4 = scmp.ne.s32.totalorder %s2091_s22, %s2087_s1  ;;  %p47_p5 = scmp.ge.s32.totalorder %s2703_s29, 2 }
  0x1c   : > { %s2658_s30 = scalar_select %p2287_p3, 1, 0 }
  0x1d   : > { %p549_p6 = scmp.eq.s32.totalorder %s1752_s28, 3  ;;  %p1755_p7 = scmp.ge.s32.totalorder %s2115_s26, 1 }
  0x1e   : > { %2659 = sst [smem:[#allocation14_spill]] %s2658_s30  ;;  %p672_p8 = scmp.lt.s32.totalorder %s2115_s26, 5 }
  0x1f   : > { %s2705_s29 = smov (%p47_p5, %s2703_s29), 0  ;;  %p2297_p9 = por %p549_p6, %p548_p4 }
  0x20   : > { %2660 = sst [smem:[#allocation15_spill]] %s2705_s29  ;;  %p673_p10 = pnand %p1755_p7, %p672_p8 }
  0x21   : > { %s2661_s0 = scalar_select %p2297_p9, 1, 0 }
  0x22   : > { %s529_s21 = ssub.s32 %s2111_s3, %s2705_s29  ;;  %s532_s27 = sadd.s32 1, %s2095_s23 }
  0x23   : > { %2662 = sst [smem:[#allocation16_spill]] %s2661_s0  ;;  %p530_p11 = scmp.eq.s32.totalorder %s529_s21, 0 }
  0x24   : > { %676 = sbr.rel (%p673_p10) target bundleno = 2419 (0x973), region = 100  ;;  %p769_p12 = scmp.lt.s32.totalorder (!%p673_p10), %s2103_s2, 1 }
  0x25   : > { %s2305_s4 = scalar_select %p530_p11, %s2095_s23, %s532_s27  }
  0x26   : > { %p773_p13 = scmp.lt.s32.totalorder (!%p673_p10), %s2099_s24, 1  ;;  %s2664_s3 = sld [smem:[#allocation18_spill]] (!%p673_p10) }
  0x27   : > { %2663 = sst [smem:[#allocation17_spill]] %s2305_s4  ;;  %s2667_s27 = sand.u32 (!%p673_p10), 1, %s2091_s22  }
  0x28   : > { %s2665_s7 = sld [smem:[#allocation23_spill]] (!%p673_p10)  ;;  %s2369_s20 = scalar_lea.vmem (!%p673_p10), [#allocation3], %s2667_s27 }
  0x29   : > { %s770_s25 = scalar_select %p769_p12, %s2103_s2, 1 }
  0x2a   : > { %s2312_s1 = scalar_select %p773_p13, %s2099_s24, 1 }
  0x2b   : > { %s1756_s21 = sshll.u32 %s770_s25, 3  ;;  %s2666_s8 = sld [smem:[#allocation24_spill]] }
  0x2c   : > { %s772_s28 = scalar_lea.vmem %s2664_s3, %s1756_s21  ;;  %s1847_s2 = sshll.u32 %s2312_s1, 4 }
  0x2d   : > { %s794_s26 = scalar_lea.vmem %s2611_s10, %s2312_s1  ;;  %s2351_s0 = scalar_lea.vmem %s2613_s12, %s1847_s2 }
  0x2e   : > { %s2329_s16 = scalar_lea.vmem %s2665_s7, %s1847_s2  ;;  %s813_s30 = scalar_lea.vmem %s2616_s15, %s2312_s1 }
  0x2f   : > { %s2668_s17 = sld [smem:[#allocation8_spill]] }
  0x31   : > { %s2334_s24 = scalar_lea.vmem %s2666_s8, %s1847_s2  ;;  %s1850_s8 = sshll.u32 %s2312_s1, 5 }
  0x32   : > { %s2361_s23 = scalar_lea.vmem %s2615_s14, %s1850_s8 }
  0x35   : > { %p1765_p0 = scmp.ne.s32.totalorder %s2668_s17, 0 }
  0x36   : > { %s2669_s18 = sld [smem:[#allocation19_spill]] (!%p1765_p0) }
  0x37   : > { %818 = sbr.rel (%p1765_p0) target bundleno = 210 (0xd2), region = 104  ;;  %s2670_s17 = sld [smem:[#allocation22_spill]] (!%p1765_p0) }
  0x38   : > { %s2671_s19 = sld [smem:[#allocation21_spill]] (!%p1765_p0) }
  0x39   : > { %s2672_s3 = sld [smem:[#allocation20_spill]] (!%p1765_p0) }
  0x3c   : > { %v1854_v0 = vld [vmem:[%s2669_s18 + $0x18] sm:$0xff]  ;;  %v1853_v1 = vld [vmem:[%s2669_s18 + $0x10] sm:$0xff]  ;;  %v1852_v2 = vld [vmem:[%s2669_s18 + $0x8] sm:$0xff]  ;;  %vm857_vm0 = vcmask 523264   ;;  %vm877_vm1 = vcmask 253952   ;;  %vm881_vm2 = vcmask 261120  }
  0x3d   : > { %865 = vmatpush.bf16.msra.mxu0 %v1854_v0  ;;  %v1851_v3 = vld [vmem:[%s2669_s18] sm:$0xff] }
  0x3e   : > { %v819_v4 = vld [vmem:[%s772_s28] sm:$0xff] }
  0x3f   : > { %v820_v5 = vpack.c.bf16 %v819_v4, %v819_v4  ;;  %v874_v6 = vld [vmem:[%s2670_s17] sm:$0x1]  ;;  %v879_v11 = vld [vmem:[%s2671_s19 + $0x1] sm:$0xff] }
  0x40   : > { %v875_v7 = vld [vmem:[%s2671_s19] sm:$0x1] }
  0x41   : > { %866 = vmatpush.bf16.msra.mxu0 %v1853_v1  ;;  %v876_v8 = vadd.f32 %v875_v7, %v874_v6  ;;  %v1954_v9 = vld [vmem:[%s2672_s3] ss:$0 sm:$0xff] }
  0x43   : > { %878 = vst.msk [vmem:[#allocation2] sm:$0x1] %vm877_vm1, %v876_v8 }
  0x45   : > { %867 = vmatpush.bf16.msra.mxu0 %v1852_v2 }
  0x49   : > { %868 = vmatpush.bf16.msra.mxu0 %v1851_v3 }
  0x4c   : > { %1782 = vmatmul.msk.bf16.vlgmr.msra.gmra.mxu0 %vm857_vm0, %v820_v5 }
  0xc9   : > { %v870_v10 = vpop.f32.mrf.mxu0 }
  0xca   : > { %v871_v12 = vadd.f32 %v1954_v9, %v870_v10 }
  0xcc   : > { %v880_v13 = vadd.f32 %v879_v11, %v871_v12 }
  0xce   : > { %882 = vst.msk [vmem:[#allocation2 + $0x1] sm:$0xff] %vm881_vm2, %v880_v13 }
  0xd1   : > { %v872_v14 = vpop.f32.mrf.mxu0 }
  0xd2 PF: > { %vm887_vm3 = vcmask 261120   ;;  %vm891_vm4 = vcmask 253952   ;;  %v2117_v19 = vmov 32.0   ;;  %v1856_v36 = vld [vmem:[%s2329_s16 + $0x8] sm:$0xff]  ;;  %v1855_v38 = vld [vmem:[%s2329_s16] sm:$0xff]  ;;  %s2673_s21 = scalar_lea.vmem %s2606_s5, %s2312_s1  ;;  %s2674_s7 = scalar_lea.vmem %s2607_s6, %s2312_s1  ;;  %vm988_vm12 = vcmask 64512  }
  0xd3   : > { %1977 = vrcp.f32 %v2117_v19  ;;  %976 = vmatpush.bf16.msra.mxu0 %v1856_v36  ;;  %v1970_v57 = vld [vmem:[%s2673_s21] ss:$0 sm:$0xff]  ;;  %s2118_s2 = smov 72   ;;  %s2119_s25 = smov 120   ;;  %vm1037_vm13 = vcmask 1043456   ;;  %vm1038_vm14 = vcmask 1044480  }
  0xd4   : > { %v1971_v62 = vld [vmem:[%s2674_s7] ss:$0 sm:$0xff]  ;;  %s2120_s8 = smov 96   ;;  %s2121_s3 = smov 64   ;;  %vm1009_vm15 = vcmask 72704   ;;  %vm1013_vm0 = vcmask 65536  }
  0xd5   : > { %v2396_v15 = vld [vmem:[#allocation2] sm:$0xff]  ;;  %v2400_v17 = vld [vmem:[#allocation2 + $0x8] sm:$0x1]  ;;  %s2122_s28 = smov 88   ;;  %s2123_s29 = smov 104   ;;  %vm1293_vm1 = vcmask 130048  }
  0xd6   : > { %v888_v16 = vsel %vm887_vm3, %v2396_v15, 0.0  ;;  %v892_v18 = vsel %vm891_vm4, %v2400_v17, 0.0  ;;  %s2124_s16 = smov 80   ;;  %s2125_s4 = smov 112   ;;  %vm1296_vm2 = vcmask 195584  }
  0xd7   : > { %889 = vadd.xlane.f32.xlu0 %v888_v16  ;;  %977 = vmatpush.bf16.msra.mxu0 %v1855_v38  ;;  %s2127_s21 = smov 56   ;;  %s2128_s27 = smov 48  }
  0xd8   : > { %s2129_s17 = smov 40   ;;  %s2130_s7 = smov 8  }
  0xd9   : > { %v1978_v20 = vpop.eup %1977 }
  0xda   : > { %v896_v21 = vmul.f32 32.0, %v1978_v20  ;;  %vm900_vm5 = vweird.f32 %v1978_v20 }
  0xdc   : > { %v897_v22 = vsub.f32 1.0, %v896_v21 }
  0xde   : > { %v898_v23 = vmul.f32 %v1978_v20, %v897_v22 }
  0xdf   : > { %893 = vadd.xlane.f32.xlu0 %v892_v18  ;;  %v2126_v18 = vmov 65535  }
  0xe0   : > { %v899_v24 = vadd.f32 %v1978_v20, %v898_v23  ;;  %v1039_v19 = vsel %vm1037_vm13, 4294967295, %v2126_v18 }
  0xe2   : > { %v2404_v25 = vsel %vm900_vm5, %v1978_v20, %v899_v24  ;;  %v2444_v20 = vsel %vm1038_vm14, %v1039_v19, 0 }
 0x14a   : > { %v890_v26 = vpop.xlane.xlu0 %889 }
 0x14b   : > { %v902_v27 = vmul.f32 %v2404_v25, %v890_v26 }
 0x14d   : > { %v904_v28 = vsub.f32 %v2396_v15, %v902_v27 }
 0x14f   : > { %v906_v29 = vmul.f32 %v904_v28, %v904_v28 }
 0x151   : > { %v908_v30 = vsel %vm887_vm3, %v906_v29, 0.0 }
 0x152   : > { %909 = vadd.xlane.f32.xlu1 %v908_v30  ;;  %v894_v31 = vpop.xlane.xlu0 %893 }
 0x153   : > { %v903_v32 = vmul.f32 %v2404_v25, %v894_v31 }
 0x155   : > { %v905_v33 = vsub.f32 %v2400_v17, %v903_v32 }
 0x157   : > { %v907_v34 = vmul.f32 %v905_v33, %v905_v33 }
 0x159   : > { %v911_v35 = vsel %vm891_vm4, %v907_v34, 0.0 }
 0x15a   : > { %912 = vadd.xlane.f32.xlu1 %v911_v35 }
 0x1c5   : > { %v910_v37 = vpop.xlane.xlu1 %909 }
 0x1c6   : > { %v914_v39 = vmul.f32 %v910_v37, %v2404_v25 }
 0x1c8   : > { %v916_v40 = vadd.f32 1e-05, %v914_v39 }
 0x1ca   : > { %1979 = vrsqrt.f32 %v916_v40  ;;  %vm924_vm7 = vweird.f32 %v916_v40 }
 0x1cd   : > { %v913_v41 = vpop.xlane.xlu1 %912 }
 0x1ce   : > { %v915_v42 = vmul.f32 %v913_v41, %v2404_v25 }
 0x1d0   : > { %v1980_v43 = vpop.eup %1979  ;;  %v917_v44 = vadd.f32 1e-05, %v915_v42 }
 0x1d1   : > { %v919_v45 = vmul.f32 %v1980_v43, %v916_v40  ;;  %vm925_vm6 = vweird.f32 %v1980_v43 }
 0x1d2   : > { %1981 = vrsqrt.f32 %v917_v44  ;;  %vm926_vm8 = vmor %vm924_vm7, %vm925_vm6  ;;  %vm934_vm10 = vweird.f32 %v917_v44 }
 0x1d3   : > { %v920_v46 = vmul.f32 %v1980_v43, %v919_v45 }
 0x1d5   : > { %v921_v47 = vmul.f32 0.5, %v920_v46 }
 0x1d7   : > { %v922_v48 = vsub.f32 1.5, %v921_v47 }
 0x1d8   : > { %v1982_v49 = vpop.eup %1981 }
 0x1d9   : > { %v923_v50 = vmul.f32 %v1980_v43, %v922_v48  ;;  %v929_v51 = vmul.f32 %v1982_v49, %v917_v44  ;;  %vm935_vm9 = vweird.f32 %v1982_v49 }
 0x1da   : > { %vm936_vm11 = vmor %vm934_vm10, %vm935_vm9 }
 0x1db   : > { %v930_v52 = vmul.f32 %v1982_v49, %v929_v51  ;;  %v927_v53 = vsel %vm926_vm8, %v1980_v43, %v923_v50 }
 0x1dc   : > { %v938_v56 = vmul.f32 %v927_v53, %v904_v28 }
 0x1dd   : > { %v931_v54 = vmul.f32 0.5, %v930_v52 }
 0x1de   : > { %v943_v61 = vmul.f32 %v1970_v57, %v938_v56 }
 0x1df   : > { %v932_v55 = vsub.f32 1.5, %v931_v54 }
 0x1e0   : > { %v948_v0 = vadd.f32 %v1971_v62, %v943_v61 }
 0x1e1   : > { %v933_v58 = vmul.f32 %v1982_v49, %v932_v55 }
 0x1e3   : > { %v937_v59 = vsel %vm936_vm11, %v1982_v49, %v933_v58  ;;  %vm1472_vm11 = vcmask 523264  }
 0x1e4   : > { %v939_v60 = vmul.f32 %v937_v59, %v905_v33 }
 0x1e6   : > { %v944_v63 = vmul.f32 %v1970_v57, %v939_v60 }
 0x1e8   : > { %v949_v1 = vadd.f32 %v1971_v62, %v944_v63 }
 0x1ea   : > { %v950_v2 = vpack.c.bf16 %v949_v1, %v948_v0 }
 0x1ec   : > { %1791 = vmatmul.msk.bf16.vlgmr.msra.gmra.mxu0 %vm887_vm3, %v950_v2 }
 0x269   : > { %v979_v3 = vpop.f32.mrf.mxu0 }
 0x271   : > { %v981_v4 = vpop.f32.mrf.mxu0 }
 0x272   : > { %v2427_v5 = vpack.c.bf16 %v981_v4, %v979_v3 }
 0x274   : > { %1200 = vrot.lane.b32.xlu1 %v2427_v5, %s2118_s2  ;;  %1060 = vrot.lane.b32.xlu0 %v2427_v5, %s2119_s25  ;;  %s2131_s2 = smov 16   ;;  %s2132_s25 = smov 24  }
 0x275   : > { %986 = vrot.lane.b32.xlu2 %v2427_v5, %s2120_s8 }
 0x27c   : > { %1032 = vrot.lane.b32.xlu1 %v2427_v5, %s2121_s3  ;;  %s2675_s3 = scalar_lea.vmem %s2610_s9, %s2312_s1 }
 0x27d   : > { %1062 = vrot.lane.b32.xlu2 %v2427_v5, %s2122_s28 }
 0x285   : > { %1198 = vrot.lane.b32.xlu2 %v2427_v5, %s2123_s29 }
 0x28d   : > { %1131 = vrot.lane.b32.xlu2 %v2427_v5, %s2124_s16 }
 0x295   : > { %1129 = vrot.lane.b32.xlu2 %v2427_v5, %s2125_s4  ;;  %s2676_s4 = scalar_lea.vmem %s2612_s11, %s2312_s1 }
 0x2cf   : > { %v987_v6 = vpop.permute.xlu2 %986 }
 0x2d0   : > { %v993_v7 = vsel %vm988_vm12, %v987_v6, 0 }
 0x2d1   : > { %1002 = vmatpush.bf16.xpose.msra.mxu1 %v993_v7 }
 0x2d7   : > { %v1063_v8 = vpop.permute.xlu2 %1062 }
 0x2d8   : > { %1792 = vmatmul.msk.bf16.vlgmr.msra.gmra.mxu1 %vm988_vm12, %v2427_v5  ;;  %v1068_v9 = vsel %vm988_vm12, %v1063_v8, 0 }
 0x2d9   : > { %1077 = vmatpush.bf16.xpose.msra.mxu3 %v1068_v9 }
 0x2df   : > { %v1199_v10 = vpop.permute.xlu2 %1198 }
 0x2e6   : > { %v1201_v11 = vpop.permute.xlu1 %1200  ;;  %v1061_v12 = vpop.permute.xlu0 %1060 }
 0x2e7   : > { %v1132_v13 = vpop.permute.xlu2 %1131  ;;  %1794 = vmatmul.msk.bf16.vlgmr.msra.gmra.mxu3 %vm988_vm12, %v1061_v12  ;;  %v1206_v14 = vsel %vm988_vm12, %v1201_v11, 0 }
 0x2e8   : > { %v1137_v16 = vsel %vm988_vm12, %v1132_v13, 0  ;;  %1215 = vmatpush.bf16.xpose.msrb.mxu3 %v1206_v14 }
 0x2e9   : > { %1146 = vmatpush.bf16.xpose.msrb.mxu0 %v1137_v16 }
 0x2ee   : > { %v1033_v21 = vpop.permute.xlu1 %1032 }
 0x2ef   : > { %v1130_v22 = vpop.permute.xlu2 %1129  ;;  %v1042_v23 = vand.u32 %v2444_v20, %v1033_v21 }
 0x2f0   : > { %1796 = vmatmul.msk.bf16.vlgmr.msrb.gmra.mxu0 %vm988_vm12, %v1130_v22 }
 0x2f1   : > { %1051 = vmatpush.bf16.msra.mxu2 %v1042_v23 }
 0x2f7   : > { %1798 = vmatmul.msk.bf16.vlgmr.msrb.gmra.mxu3 %vm988_vm12, %v1199_v10 }
 0x355   : > { %v1004_v24 = vpop.f32.mrf.mxu1 }
 0x356   : > { %v1010_v26 = vsel %vm1009_vm15, %v1004_v24, -inf }
 0x357   : > { %1011 = vmax.xlane.f32.xlu0 %v1010_v26 }
 0x35d   : > { %v1006_v27 = vpop.f32.mrf.mxu1 }
 0x35e   : > { %v1014_v28 = vsel %vm1013_vm0, %v1006_v27, -inf }
 0x35f   : > { %1015 = vmax.xlane.f32.xlu2 %v1014_v28 }
 0x36a   : > { %v1079_v29 = vpop.f32.mrf.mxu3 }
 0x36b   : > { %v1084_v30 = vsel %vm1009_vm15, %v1079_v29, -inf }
 0x36c   : > { %1085 = vmax.xlane.f32.xlu1 %v1084_v30 }
 0x36d   : > { %v1148_v31 = vpop.f32.mrf.mxu0 }
 0x36e   : > { %v1153_v32 = vsel %vm1009_vm15, %v1148_v31, -inf }
 0x36f   : > { %1154 = vmax.xlane.f32.xlu0 %v1153_v32 }
 0x372   : > { %v1081_v33 = vpop.f32.mrf.mxu3 }
 0x373   : > { %v1087_v34 = vsel %vm1013_vm0, %v1081_v33, -inf }
 0x375   : > { %v1150_v39 = vpop.f32.mrf.mxu0 }
 0x376   : > { %v1156_v40 = vsel %vm1013_vm0, %v1150_v39, -inf }
 0x377   : > { %1105 = vrot.lane.b32.xlu2 %v2427_v5, %s2127_s21  ;;  %1088 = vmax.xlane.f32.xlu0 %v1087_v34 }
 0x37a   : > { %v1217_v35 = vpop.f32.mrf.mxu3 }
 0x37b   : > { %v1222_v36 = vsel %vm1009_vm15, %v1217_v35, -inf }
 0x37f   : > { %1174 = vrot.lane.b32.xlu2 %v2427_v5, %s2128_s27  ;;  %1223 = vmax.xlane.f32.xlu0 %v1222_v36  ;;  %s2677_s27 = scalar_lea.vmem %s2614_s13, %s2312_s1 }
 0x382   : > { %v1219_v37 = vpop.f32.mrf.mxu3 }
 0x383   : > { %v1225_v38 = vsel %vm1013_vm0, %v1219_v37, -inf }
 0x384   : > { %1226 = vmax.xlane.f32.xlu1 %v1225_v38 }
 0x38c   : > { %1157 = vmax.xlane.f32.xlu1 %v1156_v40 }
 0x393   : > { %1243 = vrot.lane.b32.xlu0 %v2427_v5, %s2129_s17 }
 0x3ca   : > { %v1012_v41 = vpop.xlane.xlu0 %1011 }
 0x3cb   : > { %v1017_v42 = vsub.f32 %v1004_v24, %v1012_v41 }
 0x3cd   : > { %v1019_v43 = vmul.f32 1.442695, %v1017_v42 }
 0x3cf   : > { %1983 = vpow2.f32 %v1019_v43 }
 0x3d2   : > { %v1016_v44 = vpop.xlane.xlu2 %1015 }
 0x3d3   : > { %v1018_v45 = vsub.f32 %v1006_v27, %v1016_v44 }
 0x3d5   : > { %v1021_v46 = vmul.f32 1.442695, %v1018_v45  ;;  %v1984_v49 = vpop.eup %1983 }
 0x3d6   : > { %v1023_v11 = vsel %vm1009_vm15, %v1984_v49, 0.0 }
 0x3d7   : > { %1985 = vpow2.f32 %v1021_v46 }
 0x3da   : > { %v1106_v47 = vpop.permute.xlu2 %1105 }
 0x3db   : > { %v1111_v48 = vand.u32 %v1106_v47, %v2444_v20 }
 0x3dd   : > { %v1986_v50 = vpop.eup %1985  ;;  %1120 = vmatpush.bf16.msrb.mxu2 %v1111_v48 }
 0x3de   : > { %v1031_v51 = vpack.c.bf16 %v1986_v50, %v1984_v49  ;;  %v1026_v30 = vsel %vm1013_vm0, %v1986_v50, 0.0 }
 0x3df   : > { %v1086_v52 = vpop.xlane.xlu1 %1085 }
 0x3e0   : > { %v1090_v53 = vsub.f32 %v1079_v29, %v1086_v52  ;;  %1793 = vmatmul.msk.bf16.vlgmr.msra.gmra.mxu2 %vm1009_vm15, %v1031_v51 }
 0x3e2   : > { %v1092_v54 = vmul.f32 1.442695, %v1090_v53  ;;  %v1155_v55 = vpop.xlane.xlu0 %1154  ;;  %v1175_v56 = vpop.permute.xlu2 %1174 }
 0x3e3   : > { %v1159_v57 = vsub.f32 %v1148_v31, %v1155_v55  ;;  %v1180_v58 = vand.u32 %v1175_v56, %v2444_v20 }
 0x3e4   : > { %1987 = vpow2.f32 %v1092_v54 }
 0x3e5   : > { %1189 = vmatpush.bf16.msrb.mxu1 %v1180_v58  ;;  %v1161_v59 = vmul.f32 1.442695, %v1159_v57 }
 0x3e7   : > { %1989 = vpow2.f32 %v1161_v59 }
 0x3ea   : > { %v1988_v60 = vpop.eup %1987  ;;  %v1089_v61 = vpop.xlane.xlu0 %1088 }
 0x3eb   : > { %v1091_v62 = vsub.f32 %v1081_v33, %v1089_v61  ;;  %v1096_v63 = vsel %vm1009_vm15, %v1988_v60, 0.0 }
 0x3ec   : > { %1097 = vadd.xlane.f32.xlu1 %v1096_v63  ;;  %v1857_v63 = vld [vmem:[%s2334_s24] sm:$0xff] }
 0x3ed   : > { %v1094_v0 = vmul.f32 1.442695, %v1091_v62  ;;  %v1990_v1 = vpop.eup %1989  ;;  %v1858_v62 = vld [vmem:[%s2334_s24 + $0x8] sm:$0xff] }
 0x3ee   : > { %v1165_v4 = vsel %vm1009_vm15, %v1990_v1, 0.0  ;;  %1329 = vmatpush.bf16.msra.mxu0 %v1858_v62 }
 0x3ef   : > { %1991 = vpow2.f32 %v1094_v0 }
 0x3f2   : > { %v1224_v2 = vpop.xlane.xlu0 %1223  ;;  %1330 = vmatpush.bf16.msra.mxu0 %v1857_v63  ;;  %v1974_v63 = vld [vmem:[%s2676_s4] ss:$0 sm:$0xff] }
 0x3f3   : > { %v1228_v3 = vsub.f32 %v1217_v35, %v1224_v2 }
 0x3f4   : > { %1166 = vadd.xlane.f32.xlu1 %v1165_v4 }
 0x3f5   : > { %v1992_v5 = vpop.eup %1991  ;;  %v1230_v6 = vmul.f32 1.442695, %v1228_v3 }
 0x3f6   : > { %v1099_v7 = vsel %vm1013_vm0, %v1992_v5, 0.0  ;;  %v1104_v8 = vpack.c.bf16 %v1992_v5, %v1988_v60 }
 0x3f7   : > { %1100 = vadd.xlane.f32.xlu2 %v1099_v7  ;;  %v1227_v9 = vpop.xlane.xlu1 %1226  ;;  %1993 = vpow2.f32 %v1230_v6 }
 0x3f8   : > { %v1229_v10 = vsub.f32 %v1219_v37, %v1227_v9  ;;  %1795 = vmatmul.msk.bf16.vlgmr.msrb.gmra.mxu2 %vm1009_vm15, %v1104_v8 }
 0x3fa   : > { %v1232_v12 = vmul.f32 1.442695, %v1229_v10 }
 0x3fc   : > { %1024 = vadd.xlane.f32.xlu1 %v1023_v11  ;;  %1995 = vpow2.f32 %v1232_v12 }
 0x3fd   : > { %v1994_v14 = vpop.eup %1993 }
 0x3fe   : > { %v1234_v19 = vsel %vm1009_vm15, %v1994_v14, 0.0 }
 0x3ff   : > { %v1158_v13 = vpop.xlane.xlu1 %1157 }
 0x400   : > { %v1160_v16 = vsub.f32 %v1150_v39, %v1158_v13 }
 0x402   : > { %v1163_v18 = vmul.f32 1.442695, %v1160_v16  ;;  %v1996_v22 = vpop.eup %1995 }
 0x403   : > { %v1242_v24 = vpack.c.bf16 %v1996_v22, %v1994_v14  ;;  %v1237_v27 = vsel %vm1013_vm0, %v1996_v22, 0.0  ;;  %v1972_v22 = vld [vmem:[%s2675_s3] ss:$0 sm:$0xff] }
 0x404   : > { %1997 = vpow2.f32 %v1163_v18  ;;  %1235 = vadd.xlane.f32.xlu1 %v1234_v19 }
 0x405   : > { %v1244_v21 = vpop.permute.xlu0 %1243 }
 0x406   : > { %v1249_v23 = vand.u32 %v1244_v21, %v2444_v20 }
 0x408   : > { %1258 = vmatpush.bf16.msra.mxu2 %v1249_v23 }
 0x40a   : > { %v1998_v26 = vpop.eup %1997 }
 0x40b   : > { %1799 = vmatmul.msk.bf16.vlgmr.msra.gmra.mxu2 %vm1009_vm15, %v1242_v24  ;;  %v1168_v28 = vsel %vm1013_vm0, %v1998_v26, 0.0  ;;  %v1173_v29 = vpack.c.bf16 %v1998_v26, %v1990_v1 }
 0x40c   : > { %1238 = vadd.xlane.f32.xlu1 %v1237_v27  ;;  %1169 = vadd.xlane.f32.xlu0 %v1168_v28 }
 0x40d   : > { %1797 = vmatmul.msk.bf16.vlgmr.msrb.gmra.mxu1 %vm1009_vm15, %v1173_v29 }
 0x414   : > { %1027 = vadd.xlane.f32.xlu1 %v1026_v30 }
 0x45f   : > { %v1098_v31 = vpop.xlane.xlu1 %1097 }
 0x463   : > { %v1053_v20 = vpop.f32.mrf.mxu2 }
 0x467   : > { %v1167_v32 = vpop.xlane.xlu1 %1166 }
 0x46a   : > { %v1101_v37 = vpop.xlane.xlu2 %1100 }
 0x46b   : > { %v1055_v34 = vpop.f32.mrf.mxu2 }
 0x46f   : > { %v1025_v33 = vpop.xlane.xlu1 %1024 }
 0x470   : > { %1999 = vrcp.f32 %v1025_v33 }
 0x471   : > { %2001 = vrcp.f32 %v1098_v31 }
 0x472   : > { %2003 = vrcp.f32 %v1101_v37 }
 0x473   : > { %2005 = vrcp.f32 %v1167_v32 }
 0x476   : > { %v2000_v35 = vpop.eup %1999 }
 0x477   : > { %v1058_v36 = vmul.f32 %v2000_v35, %v1053_v20  ;;  %v2002_v39 = vpop.eup %2001  ;;  %v1236_v41 = vpop.xlane.xlu1 %1235 }
 0x478   : > { %v2004_v40 = vpop.eup %2003 }
 0x479   : > { %v2006_v50 = vpop.eup %2005 }
 0x47b   : > { %v1122_v38 = vpop.f32.mrf.mxu2 }
 0x47c   : > { %v1127_v43 = vmul.f32 %v2002_v39, %v1122_v38  ;;  %v1860_v39 = vld [vmem:[%s2351_s0 + $0x8] sm:$0xff] }
 0x47d   : > { %1425 = vmatpush.bf16.msra.mxu1 %v1860_v39 }
 0x47f   : > { %v1170_v46 = vpop.xlane.xlu0 %1169  ;;  %v1239_v48 = vpop.xlane.xlu1 %1238 }
 0x480   : > { %2007 = vrcp.f32 %v1170_v46 }
 0x481   : > { %2009 = vrcp.f32 %v1236_v41 }
 0x482   : > { %2011 = vrcp.f32 %v1239_v48 }
 0x483   : > { %v1124_v42 = vpop.f32.mrf.mxu2 }
 0x484   : > { %v1128_v44 = vmul.f32 %v2004_v40, %v1124_v42  ;;  %v1859_v42 = vld [vmem:[%s2351_s0] sm:$0xff] }
 0x485   : > { %1426 = vmatpush.bf16.msra.mxu1 %v1859_v42 }
 0x486   : > { %v1955_v45 = vpack.i.bf16 %v1128_v44, %v1127_v43  ;;  %v2008_v51 = vpop.eup %2007 }
 0x487   : > { %v2010_v55 = vpop.eup %2009  ;;  %v1028_v0 = vpop.xlane.xlu1 %1027 }
 0x488   : > { %1956 = vrot.lane.b32.xlu2 %v1955_v45, %s2130_s7  ;;  %v2012_v57 = vpop.eup %2011  ;;  %2013 = vrcp.f32 %v1028_v0 }
 0x48a   : > { %v1191_v47 = vpop.f32.mrf.mxu1 }
 0x48b   : > { %v1196_v53 = vmul.f32 %v2006_v50, %v1191_v47 }
 0x48e   : > { %v1260_v49 = vpop.f32.mrf.mxu2  ;;  %v2014_v2 = vpop.eup %2013 }
 0x48f   : > { %v1265_v59 = vmul.f32 %v2010_v55, %v1260_v49  ;;  %v1059_v8 = vmul.f32 %v2014_v2, %v1055_v34 }
 0x492   : > { %v1193_v52 = vpop.f32.mrf.mxu1 }
 0x493   : > { %v1197_v54 = vmul.f32 %v2008_v51, %v1193_v52 }
 0x495   : > { %v1960_v56 = vpack.i.bf16 %v1197_v54, %v1196_v53 }
 0x496   : > { %v1262_v58 = vpop.f32.mrf.mxu2 }
 0x497   : > { %v1266_v60 = vmul.f32 %v2012_v57, %v1262_v58  ;;  %1961 = vrot.lane.b32.xlu1 %v1960_v56, %s2131_s2 }
 0x499   : > { %v1965_v61 = vpack.i.bf16 %v1266_v60, %v1265_v59  ;;  %v1973_v59 = vld [vmem:[%s794_s26] ss:$0 sm:$0xff] }
 0x49b   : > { %1966 = vrot.lane.b32.xlu0 %v1965_v61, %s2132_s25 }
 0x4e2   : > { %v1957_v1 = vpop.permute.xlu2 %1956 }
 0x4e3   : > { %v1959_v4 = vunpack.i.h.bf16 %v1957_v1  ;;  %v1958_v5 = vunpack.i.l.bf16 %v1957_v1 }
 0x4e5   : > { %v1292_v10 = vsel %vm988_vm12, %v1059_v8, %v1959_v4  ;;  %v1291_v11 = vsel %vm988_vm12, %v1058_v36, %v1958_v5  ;;  %v1862_v8 = vld [vmem:[%s2361_s23 + $0x8] sm:$0xff] }
 0x509   : > { %v1962_v3 = vpop.permute.xlu1 %1961 }
 0x50a   : > { %v1964_v6 = vunpack.i.h.bf16 %v1962_v3  ;;  %v1963_v7 = vunpack.i.l.bf16 %v1962_v3 }
 0x50c   : > { %v1294_v14 = vsel %vm1293_vm1, %v1291_v11, %v1963_v7  ;;  %v1295_v16 = vsel %vm1293_vm1, %v1292_v10, %v1964_v6  ;;  %v1864_v6 = vld [vmem:[%s2361_s23 + $0x18] sm:$0xff]  ;;  %v1863_v7 = vld [vmem:[%s2361_s23 + $0x10] sm:$0xff]  ;;  %v1975_v11 = vld [vmem:[%s2677_s27] ss:$0 sm:$0xff] }
 0x50d   : > { %v1967_v9 = vpop.permute.xlu0 %1966  ;;  %1480 = vmatpush.bf16.msra.mxu3 %v1864_v6 }
 0x50e   : > { %v1969_v12 = vunpack.i.h.bf16 %v1967_v9  ;;  %v1968_v13 = vunpack.i.l.bf16 %v1967_v9  ;;  %v1861_v9 = vld [vmem:[%s2361_s23] sm:$0xff]  ;;  %s2678_s23 = sld [smem:[#allocation8_spill]] }
 0x510   : > { %v1297_v18 = vsel %vm1296_vm2, %v1294_v14, %v1968_v13  ;;  %v1298_v19 = vsel %vm1296_vm2, %v1295_v16, %v1969_v12 }
 0x511   : > { %v1299_v21 = vpack.c.bf16 %v1298_v19, %v1297_v18  ;;  %1481 = vmatpush.bf16.msra.mxu3 %v1863_v7 }
 0x513   : > { %1808 = vmatmul.msk.bf16.vlgmr.msra.gmra.mxu0 %vm887_vm3, %v1299_v21  ;;  %v1976_v21 = vld [vmem:[%s813_s30] ss:$0 sm:$0xff] }
 0x514   : > { %p1835_p1 = scmp.ne.s32.totalorder %s2678_s23, 1 }
 0x515   : > { %1482 = vmatpush.bf16.msra.mxu3 %v1862_v8  ;;  %s2679_s2 = sld [smem:[#allocation27_spill]] (!%p1835_p1) }
 0x516   : > { %s2681_s28 = sld [smem:[#allocation25_spill]] (!%p1835_p1) }
 0x517   : > { %s2682_s4 = sld [smem:[#allocation26_spill]] (!%p1835_p1) }
 0x518   : > { %s2683_s27 = sld [smem:[#allocation28_spill]] (!%p1835_p1) }
 0x519   : > { %1483 = vmatpush.bf16.msra.mxu3 %v1861_v9 }
 0x51b   : > { %s2680_s8 = smov (!%p1835_p1), %s2679_s2 }
 0x590   : > { %v1332_v23 = vpop.f32.mrf.mxu0 }
 0x591   : > { %v1333_v24 = vadd.f32 %v1972_v22, %v1332_v23 }
 0x593   : > { %v2486_v26 = vadd.f32 %v1333_v24, %v2396_v15 }
 0x595   : > { %v1341_v27 = vsel %vm887_vm3, %v2486_v26, 0.0 }
 0x596   : > { %1342 = vadd.xlane.f32.xlu2 %v1341_v27 }
 0x598   : > { %v1334_v28 = vpop.f32.mrf.mxu0 }
 0x599   : > { %v1335_v29 = vadd.f32 %v1972_v22, %v1334_v28 }
 0x59b   : > { %v2491_v30 = vadd.f32 %v1335_v29, %v2400_v17 }
 0x59d   : > { %v1344_v31 = vsel %vm891_vm4, %v2491_v30, 0.0 }
 0x59e   : > { %1345 = vadd.xlane.f32.xlu1 %v1344_v31 }
 0x609   : > { %v1343_v32 = vpop.xlane.xlu2 %1342 }
 0x60a   : > { %v1347_v20 = vmul.f32 %v1343_v32, %v2404_v25 }
 0x60c   : > { %v1349_v15 = vsub.f32 %v2486_v26, %v1347_v20 }
 0x60e   : > { %v1351_v33 = vmul.f32 %v1349_v15, %v1349_v15 }
 0x610   : > { %v1353_v34 = vsel %vm887_vm3, %v1351_v33, 0.0 }
 0x611   : > { %v1346_v35 = vpop.xlane.xlu1 %1345  ;;  %1354 = vadd.xlane.f32.xlu0 %v1353_v34 }
 0x612   : > { %v1348_v36 = vmul.f32 %v1346_v35, %v2404_v25 }
 0x614   : > { %v1350_v17 = vsub.f32 %v2491_v30, %v1348_v36 }
 0x616   : > { %v1352_v37 = vmul.f32 %v1350_v17, %v1350_v17 }
 0x618   : > { %v1356_v38 = vsel %vm891_vm4, %v1352_v37, 0.0 }
 0x619   : > { %1357 = vadd.xlane.f32.xlu2 %v1356_v38 }
 0x684   : > { %v1355_v40 = vpop.xlane.xlu0 %1354 }
 0x685   : > { %v1359_v41 = vmul.f32 %v1355_v40, %v2404_v25 }
 0x687   : > { %v1361_v43 = vadd.f32 1e-05, %v1359_v41 }
 0x689   : > { %2015 = vrsqrt.f32 %v1361_v43  ;;  %vm1369_vm6 = vweird.f32 %v1361_v43 }
 0x68c   : > { %v1358_v44 = vpop.xlane.xlu2 %1357 }
 0x68d   : > { %v1360_v45 = vmul.f32 %v1358_v44, %v2404_v25 }
 0x68f   : > { %v2016_v46 = vpop.eup %2015  ;;  %v1362_v47 = vadd.f32 1e-05, %v1360_v45 }
 0x690   : > { %v1364_v48 = vmul.f32 %v2016_v46, %v1361_v43  ;;  %vm1370_vm5 = vweird.f32 %v2016_v46 }
 0x691   : > { %2017 = vrsqrt.f32 %v1362_v47  ;;  %vm1371_vm7 = vmor %vm1369_vm6, %vm1370_vm5  ;;  %vm1379_vm9 = vweird.f32 %v1362_v47 }
 0x692   : > { %v1365_v49 = vmul.f32 %v2016_v46, %v1364_v48 }
 0x694   : > { %v1366_v50 = vmul.f32 0.5, %v1365_v49 }
 0x696   : > { %v1367_v51 = vsub.f32 1.5, %v1366_v50 }
 0x697   : > { %v2018_v52 = vpop.eup %2017 }
 0x698   : > { %v1368_v53 = vmul.f32 %v2016_v46, %v1367_v51  ;;  %v1374_v54 = vmul.f32 %v2018_v52, %v1362_v47  ;;  %vm1380_vm8 = vweird.f32 %v2018_v52 }
 0x699   : > { %vm1381_vm10 = vmor %vm1379_vm9, %vm1380_vm8 }
 0x69a   : > { %v1375_v55 = vmul.f32 %v2018_v52, %v1374_v54  ;;  %v1372_v56 = vsel %vm1371_vm7, %v2016_v46, %v1368_v53 }
 0x69b   : > { %v1383_v60 = vmul.f32 %v1372_v56, %v1349_v15 }
 0x69c   : > { %v1376_v57 = vmul.f32 0.5, %v1375_v55 }
 0x69d   : > { %v1388_v0 = vmul.f32 %v1973_v59, %v1383_v60 }
 0x69e   : > { %v1377_v58 = vsub.f32 1.5, %v1376_v57 }
 0x69f   : > { %v1393_v3 = vadd.f32 %v1974_v63, %v1388_v0 }
 0x6a0   : > { %v1378_v61 = vmul.f32 %v2018_v52, %v1377_v58 }
 0x6a2   : > { %v1382_v62 = vsel %vm1381_vm10, %v2018_v52, %v1378_v61 }
 0x6a3   : > { %v1384_v1 = vmul.f32 %v1382_v62, %v1350_v17 }
 0x6a5   : > { %v1389_v2 = vmul.f32 %v1973_v59, %v1384_v1 }
 0x6a7   : > { %v1394_v4 = vadd.f32 %v1974_v63, %v1389_v2 }
 0x6a9   : > { %v1395_v5 = vpack.c.bf16 %v1394_v4, %v1393_v3 }
 0x6ab   : > { %1817 = vmatmul.msk.bf16.vlgmr.msra.gmra.mxu1 %vm887_vm3, %v1395_v5 }
 0x728   : > { %v1428_v10 = vpop.f32.mrf.mxu1 }
 0x729   : > { %v1429_v12 = vadd.f32 %v1975_v11, %v1428_v10 }
 0x72b   : > { %v1433_v16 = vmax.f32 %v1429_v12, 0.0 }
 0x730   : > { %v1430_v13 = vpop.f32.mrf.mxu1 }
 0x731   : > { %v1431_v14 = vadd.f32 %v1975_v11, %v1430_v13 }
 0x733   : > { %v1434_v18 = vmax.f32 %v1431_v14, 0.0 }
 0x735   : > { %v1435_v19 = vpack.c.bf16 %v1434_v18, %v1433_v16 }
 0x737   : > { %1834 = vmatmul.msk.bf16.vlgmr.msra.gmra.mxu3 %vm1472_vm11, %v1435_v19 }
 0x7ba   : > { %v1485_v22 = vpop.f32.mrf.mxu3 }
 0x7bb   : > { %v1486_v23 = vadd.f32 %v1976_v21, %v1485_v22 }
 0x7bd   : > { %v1490_v24 = vadd.f32 %v1486_v23, %v2486_v26 }
 0x7bf   : > { %1492 = vst.msk [vmem:[#allocation2] sm:$0xff] %vm887_vm3, %v1490_v24 }
 0x7c2   : > { %v1487_v27 = vpop.f32.mrf.mxu3 }
 0x7c3   : > { %v1488_v28 = vadd.f32 %v1976_v21, %v1487_v27  ;;  %1497 = sbr.rel (%p1835_p1) target bundleno = 2398 (0x95e), region = 108 }
 0x7c5   : > { %v1491_v29 = vadd.f32 %v1488_v28, %v2491_v30 }
 0x7c7   : > { %1493 = vst.msk [vmem:[#allocation2 + $0x8] sm:$0x1] %vm891_vm4, %v1491_v29 }
 0x7c8   : > { %v1500_v31 = vsel %vm891_vm4, %v1490_v24, 0.0  ;;  %v1866_v30 = vld [vmem:[%s2679_s2 + $0x8] sm:$0xff]  ;;  %v1865_v34 = vld [vmem:[%s2680_s8] sm:$0xff]  ;;  %vm1559_vm14 = vcmask 73728  }
 0x7c9   : > { %1501 = vadd.xlane.f32.xlu0 %v1500_v31  ;;  %1552 = vmatpush.bf16.msra.mxu0 %v1866_v30  ;;  %v1498_v43 = vld [vmem:[%s2681_s28] sm:$0x1] }
 0x7ca   : > { %v1530_v50 = vld [vmem:[%s2683_s27] sm:$0x1] }
 0x7cd   : > { %1553 = vmatpush.bf16.msra.mxu0 %v1865_v34 }
 0x83c   : > { %v1502_v32 = vpop.xlane.xlu0 %1501 }
 0x83d   : > { %v1503_v20 = vmul.f32 %v1502_v32, %v2404_v25 }
 0x83f   : > { %v1504_v15 = vsub.f32 %v1490_v24, %v1503_v20 }
 0x841   : > { %v1505_v33 = vmul.f32 %v1504_v15, %v1504_v15 }
 0x843   : > { %v1506_v26 = vsel %vm891_vm4, %v1505_v33, 0.0 }
 0x844   : > { %1507 = vadd.xlane.f32.xlu0 %v1506_v26 }
 0x8b7   : > { %v1508_v35 = vpop.xlane.xlu0 %1507 }
 0x8b8   : > { %v1509_v36 = vmul.f32 %v1508_v35, %v2404_v25  ;;  %v1499_v25 = vld [vmem:[%s2682_s4] sm:$0x1] }
 0x8ba   : > { %v1510_v17 = vadd.f32 1e-05, %v1509_v36 }
 0x8bc   : > { %2019 = vrsqrt.f32 %v1510_v17  ;;  %vm1517_vm12 = vweird.f32 %v1510_v17 }
 0x8c2   : > { %v2020_v37 = vpop.eup %2019 }
 0x8c3   : > { %v1512_v38 = vmul.f32 %v2020_v37, %v1510_v17  ;;  %vm1518_vm4 = vweird.f32 %v2020_v37 }
 0x8c4   : > { %vm1519_vm13 = vmor %vm1517_vm12, %vm1518_vm4 }
 0x8c5   : > { %v1513_v39 = vmul.f32 %v2020_v37, %v1512_v38 }
 0x8c7   : > { %v1514_v40 = vmul.f32 0.5, %v1513_v39 }
 0x8c9   : > { %v1515_v41 = vsub.f32 1.5, %v1514_v40 }
 0x8cb   : > { %v1516_v42 = vmul.f32 %v2020_v37, %v1515_v41 }
 0x8cd   : > { %v1520_v44 = vsel %vm1519_vm13, %v2020_v37, %v1516_v42 }
 0x8ce   : > { %v1521_v45 = vmul.f32 %v1520_v44, %v1504_v15 }
 0x8d0   : > { %v1522_v46 = vmul.f32 %v1521_v45, %v1498_v43 }
 0x8d2   : > { %v1523_v47 = vadd.f32 %v1522_v46, %v1499_v25 }
 0x8d4   : > { %v1524_v48 = vmax.f32 %v1523_v47, 0.0 }
 0x8d6   : > { %v1525_v49 = vpack.c.bf16 %v1524_v48, %v1524_v48 }
 0x8d8   : > { %1844 = vmatmul.msk.bf16.vlgmr.msra.gmra.mxu0 %vm887_vm3, %v1525_v49 }
 0x955   : > { %v1555_v51 = vpop.f32.mrf.mxu0 }
 0x956   : > { %v1556_v52 = vadd.f32 %v1555_v51, %v1530_v50 }
 0x958   : > { %1560 = vst.msk [vmem:[%s2369_s20] sm:$0x1] %vm1559_vm14, %v1556_v52 }
 0x95d   : > { %v1557_v53 = vpop.f32.mrf.mxu0 }
 0x95e PF: > { %s2684_s17 = sld [smem:[#allocation9_spill]]  ;;  %s1572_s24 = sshll.u32 %s2369_s20, 4  ;;  %s1573_s24 = int_to_ptr.vmem [resolvable:$true] %s1572_s24 }
 0x95f   : > { %s2685_s1 = sld [smem:[#allocation29_spill]]  ;;  %s2688_s0 = sand.u32 1, %s2091_s22  }
 0x960   : > { %s1562_s28 = scalar_lea.sflag [#allocation4], %s2688_s0 }
 0x965   : > { %s2686_s30 = smov %s2685_s1  ;;  %s1570_s25 = scalar_lea.hbm %s2685_s1, %s2684_s17 }
 0x966   : > { %s1574_s3 = sshll.u32 %s1570_s25, 4  ;;  %s2041_s21 = scalar_lea.hbm %s2686_s30, 2  ;;  %s1575_s3 = int_to_ptr.hbm [resolvable:$true] %s1574_s3 }
 0x967   : > { %s2035_s29 = sshra.s32 %s1575_s3, 4  ;;  %s2036_s29 = int_to_ptr.hbm [resolvable:$true] %s2035_s29 }
 0x968   : > { %s2037_s16 = scalar_lea.hbm %s2036_s29, 1  ;;  %p2042_p6 = scmp.lt.s32.totalorder %s2036_s29, %s2686_s30 }
 0x969   : > { %p2038_p2 = scmp.ne.s32.totalorder %s2036_s29, %s2037_s16  ;;  %p2043_p7 = scmp.lt.s32.totalorder %s2041_s21, %s2037_s16 }
 0x96b   : > { %p2039_p4 = pnand %p2038_p2, %p2287_p3  ;;  %p2044_p8 = por %p2043_p7, %p2042_p6 }
 0x96d   : > { %p2040_p5 = pneg %p2039_p4 }
 0x96f   : > { %p2045_p10 = pnand %p2044_p8, %p2040_p5 }
 0x971   : > { %2048 = shalt.err (!%p2045_p10)
}
 0x972   : > { %1867 = dma.vmem_to_hbm [thread:$0]  (%p2287_p3), %s1573_s24, 16, %s1575_s3, %s1562_s28  }
 0x973 PF: > { %s2689_s20 = sld [smem:[#allocation12_spill]] }
 0x974   : > { %s2690_s17 = sld [smem:[#allocation6_spill]] }
 0x979   : > { %p1873_p11 = scmp.ge.s32.totalorder %s2689_s20, 2 }
 0x97a   : > { %s1586_s1 = sand.u32 1, %s2690_s17  }
 0x97b   : > { %p1870_p12 = pnand %p1873_p11, %p2297_p9  ;;  %s1587_s25 = scalar_lea.sflag [#allocation4], %s1586_s1 }
 0x97d   : > { %p1871_p13 = pneg %p1870_p12 }
 0x97f   : > { %2082 = dma.done.wait (%p1871_p13), %s1587_s25, 16  }
 0x980   : > { %2084 = vsyncadd (%p1871_p13), %s1587_s25, 4294967280  ;;  %s33_s26 = sadd.s32 1, %s2689_s20   ;;  %s2692_s0 = sld [smem:[#allocation7_spill]] }
 0x981   : > { %p30_p0 = scmp.ge.s32.totalorder %s33_s26, 6   ;;  %s2693_s23 = sld [smem:[#allocation17_spill]] }
 0x982   : > { %s2694_s24 = sld [smem:[#allocation10_spill]]  ;;  %s2698_s1 = smov %s2091_s22 }
 0x983   : > { %s2695_s2 = sld [smem:[#allocation11_spill]]  ;;  %32 = sbr.rel (!%p30_p0) target bundleno = 18 (0x12), region = 176 }
 0x984   : > { %s2696_s25 = sld [smem:[#allocation13_spill]] }
 0x985   : > { %s2697_s3 = sld [smem:[#allocation15_spill]] }
 0x986   : > { %s2699_s22 = smov %s2692_s0 }
 0x988   :  { %1592 = vsyncpa [#allocation4], 1 }
 0x989   :  { %1594 = vsyncpa [#allocation4 + $0x1], 1 }

</bundles_post_ra>
